<compile_context>
chip_gen: v6e
topology: v6e:2x2x1
jax: 0.10.0
libtpu: 0.0.40
codegen_flags: <defaults>
</compile_context>

<pallas_src>
import math
import numpy as np
import jax
import jax.numpy as jnp
from jax import lax
from jax.experimental import pallas as pl
from jax.experimental.pallas import tpu as pltpu


# ---------------------------------------------------------------------------
# numpy setup helpers (mirror of the PyTorch module's __init__ glue)
# ---------------------------------------------------------------------------
def get_dicke_klist(dim, num_qudit):
    hf0 = lambda d, n: [(n,)] if d <= 1 else [(x,) + y for x in range(n + 1) for y in hf0(d - 1, n - x)]
    return hf0(dim, num_qudit)


def get_klist_binom_term(klist_np):
    klist_np = np.asarray(klist_np, dtype=np.int64)
    num_qudit = int(klist_np[0].sum())
    tmp0 = num_qudit - np.cumsum(
        np.pad(klist_np, [(0, 0), (1, 0)], mode="constant", constant_values=0)[:, :-1], axis=1)
    ret = np.array([[math.comb(int(n), int(k)) for k, n in zip(krow, nrow)]
                    for krow, nrow in zip(klist_np, tmp0)], dtype=np.float64).prod(axis=1)
    return ret


def get_klist_permutation_index(klist):
    klist_dict = {tuple(y): x for x, y in enumerate(klist)}
    klist_np = np.array(klist)
    ret = [np.arange(len(klist))]
    for ind0 in range(1, len(klist[0])):
        tmp0 = np.roll(klist_np, ind0, axis=1).tolist()
        ret.append(np.array([klist_dict[tuple(x)] for x in tmp0]))
    return ret


def get_qudit_H(dimD):
    tmp0 = np.exp(2j * np.pi * np.arange(dimD) / dimD)
    return np.vander(tmp0, dimD, increasing=True) / np.sqrt(dimD)


def get_mps_dicke_transform_matrix(dim, num_qudit, num_more_space=1.05, seed=0):
    np_rng = np.random.default_rng(seed)
    num_dicke = math.comb(num_qudit + dim - 1, dim - 1)
    num_mps = max(int(num_dicke * num_more_space), num_dicke + 3)
    mps_alpha = np_rng.normal(size=(num_mps, dim * 2)).astype(np.float64).view(np.complex128)
    mps_alpha /= np.linalg.norm(mps_alpha, axis=1, keepdims=True)
    klist = np.array(get_dicke_klist(dim, num_qudit))
    binom_term = np.sqrt(get_klist_binom_term(klist))
    matA = np.prod(mps_alpha.reshape(num_mps, 1, dim) ** klist.reshape(1, num_dicke, dim), axis=2) * binom_term
    U, S, V = np.linalg.svd(matA, full_matrices=False)
    assert S[-1] > 1e-7, "not full rank"
    matB = V.T.conj() / S @ U.T.conj()
    return mps_alpha, klist, matA, matB


def get_qudit_XZ_np(theta, dim, H):
    # theta: (num_XZ, 2)
    th = theta.T.reshape(2, -1, 1)
    Xtheta, Ztheta = np.exp(2j * np.pi * np.arange(dim) * th)
    Hc = H.T.conj()
    ret = (H * Xtheta[0]) @ (Hc * Ztheta[0])
    for i in range(1, Xtheta.shape[0]):
        ret = (H * Xtheta[i]) @ (Hc * Ztheta[i]) @ ret
    return ret


def get_partial_trace_T(klist_np, kext):
    # T[i*dim+j, n, m] : coefficient of D[a,n]*conj(D[a',m]) in rho[(a,i),(a',j)]
    klist = [tuple(int(v) for v in row) for row in klist_np.tolist()]
    idx = {k: i for i, k in enumerate(klist)}
    dim, Nd = len(klist[0]), len(klist)
    T = np.zeros((dim * dim, Nd, Nd), dtype=np.float64)
    for i in range(dim):
        for j in range(dim):
            for n_i, n in enumerate(klist):
                if n[i] > 0:
                    m = list(n); m[i] -= 1; m[j] += 1
                    T[i * dim + j, n_i, idx[tuple(m)]] = math.sqrt(n[i] * m[j]) / kext
    return T


# ---------------------------------------------------------------------------
# numpy reference (complex128) of the PyTorch forward
# ---------------------------------------------------------------------------
def reference_forward(theta_np, dimA, dimB, mps_basis_alpha, matB, klist_np,
                      binom_term, perm_idx, H, Tmat, op):
    mps_p = np.zeros((dimA, 1), dtype=np.complex128); mps_p[0, 0] = 1.0
    mps_alpha = np.zeros((1, dimB), dtype=np.complex128); mps_alpha[0, 0] = 1.0
    Nd = klist_np.shape[0]
    dicke_p = None
    for l in range(theta_np.shape[0]):
        UA = get_qudit_XZ_np(theta_np[l, 0], dimA, H)
        UB = get_qudit_XZ_np(theta_np[l, 1], dimB, H)
        mps_p = UA @ mps_p
        mps_alpha = mps_alpha @ UB.T
        tmp1 = np.prod(mps_alpha.reshape(-1, 1, dimB) ** klist_np.reshape(1, Nd, dimB), axis=2)
        dicke_p = (mps_p @ tmp1) * binom_term
        dicke_p = np.stack([dicke_p[a][perm_idx[a]] for a in range(dimA)])
        mps_p = dicke_p @ matB
        mps_alpha = mps_basis_alpha
    rho = np.zeros((dimA, dimB, dimA, dimB), dtype=np.complex128)
    for i in range(dimB):
        for j in range(dimB):
            rho[:, i, :, j] = dicke_p @ Tmat[i * dimB + j] @ dicke_p.conj().T
    dm = rho.reshape(dimA * dimB, dimA * dimB)
    loss = float(np.real(np.sum(dm.reshape(-1) * op.T.reshape(-1))))
    return loss, dm


# ---------------------------------------------------------------------------
# Pallas kernel
# ---------------------------------------------------------------------------
def make_pureb_kernel(dimA, dimB, num_mps, num_layer, klist):
    Nd = len(klist)
    f32 = jnp.float32
    dn_bt = (((1,), (1,)), ((), ()))  # contract last dims: A @ B.T
    kmax = [max(int(row[d]) for row in klist) for d in range(dimB)]

    def kernel(ua_ref, ub_ref, p0_ref, a0_ref, abasis_ref,
               qb_ref, qd_ref, tb_ref, op_ref,
               blk_ref, loss_ref,
               t1r_scr, t1i_scr, p_scr, dd_scr):
        # packed states: mps_p as [Pr; Pi] (2*dimA, num_mps),
        #                mps_alpha^T as [Ar; Ai] (2*dimB, num_mps)
        p_cur = p0_ref[...]
        a_cur = a0_ref[...]

        for l in range(num_layer):
            # ---- single-qudit gates: one packed real dot each --------------
            p_cur = jnp.dot(ua_ref[l], p_cur, preferred_element_type=f32)
            a_cur = jnp.dot(ub_ref[l], a_cur, preferred_element_type=f32)

            # ---- power table: alpha_d^k for k = 1..kmax[d] (VPU only) ------
            pow_r, pow_i = [], []
            for d in range(dimB):
                ar_d = a_cur[d:d + 1, :]
                ai_d = a_cur[dimB + d:dimB + d + 1, :]
                pr_l, pi_l = [None, ar_d], [None, ai_d]
                for _ in range(2, kmax[d] + 1):
                    pr_p, pi_p = pr_l[-1], pi_l[-1]
                    pr_l.append(pr_p * ar_d - pi_p * ai_d)
                    pi_l.append(pr_p * ai_d + pi_p * ar_d)
                pow_r.append(pr_l)
                pow_i.append(pi_l)

            # ---- t1[n,m] = prod_d alpha[m,d]^klist[n,d] -> VMEM scratch ----
            for n in range(Nd):
                facs = [(pow_r[d][int(klist[n][d])], pow_i[d][int(klist[n][d])])
                        for d in range(dimB) if int(klist[n][d]) > 0]
                if facs:
                    cr, ci = facs[0]
                    for fr, fi in facs[1:]:
                        cr, ci = cr * fr - ci * fi, cr * fi + ci * fr
                else:
                    cr = jnp.ones((1, num_mps), f32)
                    ci = jnp.zeros((1, num_mps), f32)
                t1r_scr[n:n + 1, :] = cr
                t1i_scr[n:n + 1, :] = ci

            # ---- D_int = mps_p @ t1^T : two real dots on the packed state --
            dot_r = lax.dot_general(p_cur, t1r_scr[...], dn_bt, preferred_element_type=f32)
            dot_i = lax.dot_general(p_cur, t1i_scr[...], dn_bt, preferred_element_type=f32)
            dr = dot_r[0:dimA, :] - dot_i[dimA:2 * dimA, :]
            di = dot_i[0:dimA, :] + dot_r[dimA:2 * dimA, :]
            d_pack = jnp.concatenate([dr, di], axis=1)        # (dimA, 2*Nd) = [Dr | Di]

            if l < num_layer - 1:
                # fused binom * permutation * matB: one packed dot per row a
                for a in range(dimA):
                    row = jnp.dot(d_pack[a:a + 1, :], qb_ref[a], preferred_element_type=f32)
                    p_scr[a:a + 1, :] = row[:, 0:num_mps]
                    p_scr[dimA + a:dimA + a + 1, :] = row[:, num_mps:2 * num_mps]
                p_cur = p_scr[...]
                a_cur = abasis_ref[...]
            else:
                # last layer: permuted dicke_p (binom folded in) -> DD scratch
                # DD = [[Dr | Di], [-Di | Dr]]  (2*dimA, 2*Nd)
                for a in range(dimA):
                    row = jnp.dot(d_pack[a:a + 1, :], qd_ref[a], preferred_element_type=f32)
                    rr = row[:, 0:Nd]
                    ri = row[:, Nd:2 * Nd]
                    dd_scr[a:a + 1, 0:Nd] = rr
                    dd_scr[a:a + 1, Nd:2 * Nd] = ri
                    dd_scr[dimA + a:dimA + a + 1, 0:Nd] = -ri
                    dd_scr[dimA + a:dimA + a + 1, Nd:2 * Nd] = rr

        # ---- batched partial trace ABk -> AB + expectation loss ------------
        dd = dd_scr[...]                      # (2*dimA, 2*Nd)
        d_fin = dd[0:dimA, :]                 # (dimA, 2*Nd) = [Dr | Di]
        # one dot: [Dr@T_ij | Di@T_ij] for all (i,j), lane-blocked
        m_all = jnp.dot(d_fin, tb_ref[...], preferred_element_type=f32)   # (dimA, dimB^2*2*Nd)
        blocks = []
        for k in range(dimB * dimB):
            mk = m_all[:, k * 2 * Nd:(k + 1) * 2 * Nd]
            # [Re(M_k @ D^H) | Im(M_k @ D^H)] in one packed dot -> (dimA, 2*dimA)
            blocks.append(lax.dot_general(mk, dd, dn_bt, preferred_element_type=f32))
        blk_cat = jnp.concatenate(blocks, axis=1)            # (dimA, dimB^2*2*dimA)
        blk_ref[...] = blk_cat                                # single lane-dense store
        # loss = Re Tr(rho @ op): one elementwise product + one reduction,
        # computed from the in-register value (no read-back of the output ref)
        loss_ref[...] = jnp.sum(blk_cat * op_ref[...], keepdims=True)

    return kernel


def pureb_forward_pallas(args, dimA, dimB, num_mps, num_layer, klist):
    Nd = len(klist)
    f32 = jnp.float32
    kernel = make_pureb_kernel(dimA, dimB, num_mps, num_layer, klist)
    vmem = pl.BlockSpec(memory_space=pltpu.MemorySpace.VMEM)
    out_shape = (
        jax.ShapeDtypeStruct((dimA, dimB * dimB * 2 * dimA), f32),   # lane-dense block slab
        jax.ShapeDtypeStruct((1, 1), f32),                           # loss
    )
    fn = pl.pallas_call(
        kernel,
        out_shape=out_shape,
        in_specs=[vmem] * len(args),
        out_specs=(vmem, vmem),
        scratch_shapes=[
            pltpu.VMEM((Nd, num_mps), f32),        # t1 real
            pltpu.VMEM((Nd, num_mps), f32),        # t1 imag
            pltpu.VMEM((2 * dimA, num_mps), f32),  # next mps_p packed
            pltpu.VMEM((2 * dimA, 2 * Nd), f32),   # final dicke_p block [[Dr|Di],[-Di|Dr]]
        ],
    )
    return fn(*args)


# ---------------------------------------------------------------------------
if __name__ == "__main__":
    dimA, dimB, num_kext, num_layer = 2, 2, 4, 3
    num_XZ = max(math.ceil((dimB * dimB - 1) / 2), 3)

    mps_basis_alpha, klist_np, matA, matB = get_mps_dicke_transform_matrix(dimB, num_kext, seed=0)
    Nd, num_mps = klist_np.shape[0], mps_basis_alpha.shape[0]
    klist = [tuple(int(v) for v in row) for row in klist_np.tolist()]
    binom_term = np.sqrt(get_klist_binom_term(klist_np))
    perm_idx = get_klist_permutation_index(klist)
    H = get_qudit_H(dimB)
    Tmat = get_partial_trace_T(klist_np, num_kext)

    # deterministic parameters / observable
    key = jax.random.PRNGKey(0)
    k_theta, k_op = jax.random.split(key)
    theta = np.asarray(jax.random.uniform(k_theta, (num_layer, 2, num_XZ, 2), dtype=jnp.float32),
                       dtype=np.float64)
    dAB = dimA * dimB
    op_raw = np.asarray(jax.random.normal(k_op, (dAB, dAB, 2), dtype=jnp.float32), dtype=np.float64)
    op = op_raw[..., 0] + 1j * op_raw[..., 1]
    op = 0.5 * (op + op.conj().T)           # Hermitian expectation operator

    # per-layer unitaries (parameter glue, built at complex128 precision)
    UA = np.stack([get_qudit_XZ_np(theta[l, 0], dimA, H) for l in range(num_layer)])
    UB = np.stack([get_qudit_XZ_np(theta[l, 1], dimB, H) for l in range(num_layer)])

    # permutation matrices Q[a] s.t. row @ Q[a] == row[perm_idx[a]]
    Q = np.zeros((dimA, Nd, Nd), dtype=np.float64)
    for a in range(dimA):
        for i_new, j_old in enumerate(perm_idx[a]):
            Q[a, j_old, i_new] = 1.0

    # ---- host-side packed / fused matrices ---------------------------------
    def left_block(U):    # for U @ [Xr; Xi]
        return np.block([[U.real, -U.imag], [U.imag, U.real]])

    def right_block(B):   # for [Xr | Xi] @ blk -> [Re(X@B) | Im(X@B)]
        return np.block([[B.real, B.imag], [-B.imag, B.real]])

    UA_blk = np.stack([left_block(UA[l]) for l in range(num_layer)])          # (L, 2dA, 2dA)
    UB_blk = np.stack([left_block(UB[l]) for l in range(num_layer)])          # (L, 2dB, 2dB)
    # fused binom * permutation * matB   (and binom * permutation for last layer)
    QB_blk = np.stack([right_block((binom_term[:, None] * Q[a]) @ matB) for a in range(dimA)])
    QD_blk = np.stack([right_block((binom_term[:, None] * Q[a]).astype(np.complex128))
                       for a in range(dimA)])
    # stacked partial-trace operator: column block k holds [[T_k, 0],[0, T_k]]
    TB_blk = np.zeros((2 * Nd, dimB * dimB * 2 * Nd), dtype=np.float64)
    for k in range(dimB * dimB):
        TB_blk[0:Nd, k * 2 * Nd:k * 2 * Nd + Nd] = Tmat[k]
        TB_blk[Nd:2 * Nd, k * 2 * Nd + Nd:(k + 1) * 2 * Nd] = Tmat[k]
    # op rearranged to match the packed block layout:  loss = sum(blocks * op_pack)
    op4 = op.reshape(dimA, dimB, dimA, dimB)                       # [a', j, a, i]
    op_r = op4.transpose(3, 1, 2, 0).reshape(dimB * dimB, dimA, dimA)  # [i*dB+j, a, a']
    op_pack = np.zeros((dimA, dimB * dimB * 2 * dimA), dtype=np.float64)
    for k in range(dimB * dimB):
        op_pack[:, k * 2 * dimA:k * 2 * dimA + dimA] = op_r[k].real
        op_pack[:, k * 2 * dimA + dimA:(k + 1) * 2 * dimA] = -op_r[k].imag

    # padded initial MPS states (only column 0 active; extra columns contribute 0)
    p0_pack = np.zeros((2 * dimA, num_mps)); p0_pack[0, 0] = 1.0
    a0_pack = np.zeros((2 * dimB, num_mps)); a0_pack[0, 0] = 1.0
    abasis_pack = np.concatenate([mps_basis_alpha.T.real, mps_basis_alpha.T.imag], axis=0)

    f32 = np.float32
    np_args = (
        UA_blk.astype(f32), UB_blk.astype(f32),
        p0_pack.astype(f32), a0_pack.astype(f32), abasis_pack.astype(f32),
        QB_blk.astype(f32), QD_blk.astype(f32),
        TB_blk.astype(f32), op_pack.astype(f32),
    )
    args = tuple(jnp.asarray(a) for a in np_args)

    blk_out, loss_out = pureb_forward_pallas(args, dimA, dimB, num_mps, num_layer, klist)
    jax.block_until_ready((blk_out, loss_out))

    # reassemble dm from the lane-dense block slab (layout glue only)
    blk_np = np.asarray(blk_out)
    rho = np.zeros((dimA, dimB, dimA, dimB), dtype=np.complex128)
    for i in range(dimB):
        for j in range(dimB):
            k = i * dimB + j
            re = blk_np[:, k * 2 * dimA:k * 2 * dimA + dimA]
            im = blk_np[:, k * 2 * dimA + dimA:(k + 1) * 2 * dimA]
            rho[:, i, :, j] = re + 1j * im
    dm = rho.reshape(dAB, dAB)
    loss_val = float(np.asarray(loss_out)[0, 0])

    loss_ref, dm_ref = reference_forward(theta, dimA, dimB, mps_basis_alpha, matB,
                                         klist_np, binom_term, perm_idx, H, Tmat, op)
    # float32 kernel vs complex128 reference -> loose tolerance
    assert np.allclose(loss_val, loss_ref, atol=5e-3, rtol=5e-3), (loss_val, loss_ref)
    assert np.allclose(dm, dm_ref, atol=5e-3), float(np.abs(dm - dm_ref).max())
    print("KERNEL_OK")
</pallas_src>

<mosaic_0001>
module attributes {stable_mosaic.version = 11 : i64} {
  func.func @kernel(%arg0: memref<3x4x4xf32, #tpu.memory_space<vmem>>, %arg1: memref<3x4x4xf32, #tpu.memory_space<vmem>>, %arg2: memref<4x8xf32, #tpu.memory_space<vmem>>, %arg3: memref<4x8xf32, #tpu.memory_space<vmem>>, %arg4: memref<4x8xf32, #tpu.memory_space<vmem>>, %arg5: memref<2x10x16xf32, #tpu.memory_space<vmem>>, %arg6: memref<2x10x10xf32, #tpu.memory_space<vmem>>, %arg7: memref<10x40xf32, #tpu.memory_space<vmem>>, %arg8: memref<2x16xf32, #tpu.memory_space<vmem>>, %arg9: memref<2x16xf32, #tpu.memory_space<vmem>>, %arg10: memref<1x1xf32, #tpu.memory_space<vmem>>, %arg11: memref<5x8xf32, #tpu.memory_space<vmem>>, %arg12: memref<5x8xf32, #tpu.memory_space<vmem>>, %arg13: memref<4x8xf32, #tpu.memory_space<vmem>>, %arg14: memref<4x10xf32, #tpu.memory_space<vmem>>) attributes {dimension_semantics = [], scalar_prefetch = 0 : i64, scratch_operands = 4 : i64, tpu.core_type = #tpu.core_type<tc>} {
    %c0 = arith.constant 0 : index
    %c0_0 = arith.constant 0 : index
    %0 = vector.load %arg2[%c0, %c0_0] : memref<4x8xf32, #tpu.memory_space<vmem>>, vector<4x8xf32>
    %c0_1 = arith.constant 0 : index
    %c0_2 = arith.constant 0 : index
    %1 = vector.load %arg3[%c0_1, %c0_2] : memref<4x8xf32, #tpu.memory_space<vmem>>, vector<4x8xf32>
    %c0_3 = arith.constant 0 : index
    %c0_4 = arith.constant 0 : index
    %c0_5 = arith.constant 0 : index
    %2 = vector.load %arg0[%c0_3, %c0_4, %c0_5] : memref<3x4x4xf32, #tpu.memory_space<vmem>>, vector<1x4x4xf32>
    %3 = vector.shape_cast %2 : vector<1x4x4xf32> to vector<4x4xf32>
    %cst = arith.constant dense<0.000000e+00> : vector<4x8xf32>
    %4 = tpu.matmul %3, %0, %cst {dimension_numbers = #tpu.dot_dimension_numbers<[1], [0], [0], [1], [0, 0, 1, 1], [], []>} : vector<4x4xf32>, vector<4x8xf32>, vector<4x8xf32> -> vector<4x8xf32>
    %c0_6 = arith.constant 0 : index
    %c0_7 = arith.constant 0 : index
    %c0_8 = arith.constant 0 : index
    %5 = vector.load %arg1[%c0_6, %c0_7, %c0_8] : memref<3x4x4xf32, #tpu.memory_space<vmem>>, vector<1x4x4xf32>
    %6 = vector.shape_cast %5 : vector<1x4x4xf32> to vector<4x4xf32>
    %cst_9 = arith.constant dense<0.000000e+00> : vector<4x8xf32>
    %7 = tpu.matmul %6, %1, %cst_9 {dimension_numbers = #tpu.dot_dimension_numbers<[1], [0], [0], [1], [0, 0, 1, 1], [], []>} : vector<4x4xf32>, vector<4x8xf32>, vector<4x8xf32> -> vector<4x8xf32>
    %8 = vector.extract_strided_slice %7 {offsets = [0, 0], sizes = [1, 8], strides = [1, 1]} : vector<4x8xf32> to vector<1x8xf32>
    %9 = vector.extract_strided_slice %7 {offsets = [2, 0], sizes = [1, 8], strides = [1, 1]} : vector<4x8xf32> to vector<1x8xf32>
    %10 = arith.mulf %8, %8 : vector<1x8xf32>
    %11 = arith.mulf %9, %9 : vector<1x8xf32>
    %12 = arith.subf %10, %11 : vector<1x8xf32>
    %13 = arith.mulf %8, %9 : vector<1x8xf32>
    %14 = arith.mulf %9, %8 : vector<1x8xf32>
    %15 = arith.addf %13, %14 : vector<1x8xf32>
    %16 = arith.mulf %12, %8 : vector<1x8xf32>
    %17 = arith.mulf %15, %9 : vector<1x8xf32>
    %18 = arith.subf %16, %17 : vector<1x8xf32>
    %19 = arith.mulf %12, %9 : vector<1x8xf32>
    %20 = arith.mulf %15, %8 : vector<1x8xf32>
    %21 = arith.addf %19, %20 : vector<1x8xf32>
    %22 = arith.mulf %18, %8 : vector<1x8xf32>
    %23 = arith.mulf %21, %9 : vector<1x8xf32>
    %24 = arith.subf %22, %23 : vector<1x8xf32>
    %25 = arith.mulf %18, %9 : vector<1x8xf32>
    %26 = arith.mulf %21, %8 : vector<1x8xf32>
    %27 = arith.addf %25, %26 : vector<1x8xf32>
    %28 = vector.extract_strided_slice %7 {offsets = [1, 0], sizes = [1, 8], strides = [1, 1]} : vector<4x8xf32> to vector<1x8xf32>
    %29 = vector.extract_strided_slice %7 {offsets = [3, 0], sizes = [1, 8], strides = [1, 1]} : vector<4x8xf32> to vector<1x8xf32>
    %30 = arith.mulf %28, %28 : vector<1x8xf32>
    %31 = arith.mulf %29, %29 : vector<1x8xf32>
    %32 = arith.subf %30, %31 : vector<1x8xf32>
    %33 = arith.mulf %28, %29 : vector<1x8xf32>
    %34 = arith.mulf %29, %28 : vector<1x8xf32>
    %35 = arith.addf %33, %34 : vector<1x8xf32>
    %36 = arith.mulf %32, %28 : vector<1x8xf32>
    %37 = arith.mulf %35, %29 : vector<1x8xf32>
    %38 = arith.subf %36, %37 : vector<1x8xf32>
    %39 = arith.mulf %32, %29 : vector<1x8xf32>
    %40 = arith.mulf %35, %28 : vector<1x8xf32>
    %41 = arith.addf %39, %40 : vector<1x8xf32>
    %42 = arith.mulf %38, %28 : vector<1x8xf32>
    %43 = arith.mulf %41, %29 : vector<1x8xf32>
    %44 = arith.subf %42, %43 : vector<1x8xf32>
    %45 = arith.mulf %38, %29 : vector<1x8xf32>
    %46 = arith.mulf %41, %28 : vector<1x8xf32>
    %47 = arith.addf %45, %46 : vector<1x8xf32>
    %c0_10 = arith.constant 0 : index
    %c0_11 = arith.constant 0 : index
    %48 = vector.load %arg11[%c0_10, %c0_11] : memref<5x8xf32, #tpu.memory_space<vmem>>, vector<1x8xf32>
    tpu.vector_store %arg11[%c0_10, %c0_11], %44 {strides = array<i32>} : memref<5x8xf32, #tpu.memory_space<vmem>>, vector<1x8xf32>,
    %c0_12 = arith.constant 0 : index
    %c0_13 = arith.constant 0 : index
    %49 = vector.load %arg12[%c0_12, %c0_13] : memref<5x8xf32, #tpu.memory_space<vmem>>, vector<1x8xf32>
    tpu.vector_store %arg12[%c0_12, %c0_13], %47 {strides = array<i32>} : memref<5x8xf32, #tpu.memory_space<vmem>>, vector<1x8xf32>,
    %50 = arith.mulf %8, %38 : vector<1x8xf32>
    %51 = arith.mulf %9, %41 : vector<1x8xf32>
    %52 = arith.subf %50, %51 : vector<1x8xf32>
    %53 = arith.mulf %8, %41 : vector<1x8xf32>
    %54 = arith.mulf %9, %38 : vector<1x8xf32>
    %55 = arith.addf %53, %54 : vector<1x8xf32>
    %c1 = arith.constant 1 : index
    %c0_14 = arith.constant 0 : index
    %56 = vector.load %arg11[%c1, %c0_14] : memref<5x8xf32, #tpu.memory_space<vmem>>, vector<1x8xf32>
    tpu.vector_store %arg11[%c1, %c0_14], %52 {strides = array<i32>} : memref<5x8xf32, #tpu.memory_space<vmem>>, vector<1x8xf32>,
    %c1_15 = arith.constant 1 : index
    %c0_16 = arith.constant 0 : index
    %57 = vector.load %arg12[%c1_15, %c0_16] : memref<5x8xf32, #tpu.memory_space<vmem>>, vector<1x8xf32>
    tpu.vector_store %arg12[%c1_15, %c0_16], %55 {strides = array<i32>} : memref<5x8xf32, #tpu.memory_space<vmem>>, vector<1x8xf32>,
    %58 = arith.mulf %12, %32 : vector<1x8xf32>
    %59 = arith.mulf %15, %35 : vector<1x8xf32>
    %60 = arith.subf %58, %59 : vector<1x8xf32>
    %61 = arith.mulf %12, %35 : vector<1x8xf32>
    %62 = arith.mulf %15, %32 : vector<1x8xf32>
    %63 = arith.addf %61, %62 : vector<1x8xf32>
    %c2 = arith.constant 2 : index
    %c0_17 = arith.constant 0 : index
    %64 = vector.load %arg11[%c2, %c0_17] : memref<5x8xf32, #tpu.memory_space<vmem>>, vector<1x8xf32>
    tpu.vector_store %arg11[%c2, %c0_17], %60 {strides = array<i32>} : memref<5x8xf32, #tpu.memory_space<vmem>>, vector<1x8xf32>,
    %c2_18 = arith.constant 2 : index
    %c0_19 = arith.constant 0 : index
    %65 = vector.load %arg12[%c2_18, %c0_19] : memref<5x8xf32, #tpu.memory_space<vmem>>, vector<1x8xf32>
    tpu.vector_store %arg12[%c2_18, %c0_19], %63 {strides = array<i32>} : memref<5x8xf32, #tpu.memory_space<vmem>>, vector<1x8xf32>,
    %66 = arith.mulf %18, %28 : vector<1x8xf32>
    %67 = arith.mulf %21, %29 : vector<1x8xf32>
    %68 = arith.subf %66, %67 : vector<1x8xf32>
    %69 = arith.mulf %18, %29 : vector<1x8xf32>
    %70 = arith.mulf %21, %28 : vector<1x8xf32>
    %71 = arith.addf %69, %70 : vector<1x8xf32>
    %c3 = arith.constant 3 : index
    %c0_20 = arith.constant 0 : index
    %72 = vector.load %arg11[%c3, %c0_20] : memref<5x8xf32, #tpu.memory_space<vmem>>, vector<1x8xf32>
    tpu.vector_store %arg11[%c3, %c0_20], %68 {strides = array<i32>} : memref<5x8xf32, #tpu.memory_space<vmem>>, vector<1x8xf32>,
    %c3_21 = arith.constant 3 : index
    %c0_22 = arith.constant 0 : index
    %73 = vector.load %arg12[%c3_21, %c0_22] : memref<5x8xf32, #tpu.memory_space<vmem>>, vector<1x8xf32>
    tpu.vector_store %arg12[%c3_21, %c0_22], %71 {strides = array<i32>} : memref<5x8xf32, #tpu.memory_space<vmem>>, vector<1x8xf32>,
    %c4 = arith.constant 4 : index
    %c0_23 = arith.constant 0 : index
    %74 = vector.load %arg11[%c4, %c0_23] : memref<5x8xf32, #tpu.memory_space<vmem>>, vector<1x8xf32>
    tpu.vector_store %arg11[%c4, %c0_23], %24 {strides = array<i32>} : memref<5x8xf32, #tpu.memory_space<vmem>>, vector<1x8xf32>,
    %c4_24 = arith.constant 4 : index
    %c0_25 = arith.constant 0 : index
    %75 = vector.load %arg12[%c4_24, %c0_25] : memref<5x8xf32, #tpu.memory_space<vmem>>, vector<1x8xf32>
    tpu.vector_store %arg12[%c4_24, %c0_25], %27 {strides = array<i32>} : memref<5x8xf32, #tpu.memory_space<vmem>>, vector<1x8xf32>,
    %c0_26 = arith.constant 0 : index
    %c0_27 = arith.constant 0 : index
    %76 = vector.load %arg11[%c0_26, %c0_27] : memref<5x8xf32, #tpu.memory_space<vmem>>, vector<5x8xf32>
    %cst_28 = arith.constant dense<0.000000e+00> : vector<4x5xf32>
    %77 = tpu.matmul %4, %76, %cst_28 {dimension_numbers = #tpu.dot_dimension_numbers<[1], [1], [0], [0], [0, 0, 1, 0], [], []>} : vector<4x8xf32>, vector<5x8xf32>, vector<4x5xf32> -> vector<4x5xf32>
    %c0_29 = arith.constant 0 : index
    %c0_30 = arith.constant 0 : index
    %78 = vector.load %arg12[%c0_29, %c0_30] : memref<5x8xf32, #tpu.memory_space<vmem>>, vector<5x8xf32>
    %cst_31 = arith.constant dense<0.000000e+00> : vector<4x5xf32>
    %79 = tpu.matmul %4, %78, %cst_31 {dimension_numbers = #tpu.dot_dimension_numbers<[1], [1], [0], [0], [0, 0, 1, 0], [], []>} : vector<4x8xf32>, vector<5x8xf32>, vector<4x5xf32> -> vector<4x5xf32>
    %80 = vector.extract_strided_slice %77 {offsets = [0, 0], sizes = [2, 5], strides = [1, 1]} : vector<4x5xf32> to vector<2x5xf32>
    %81 = vector.extract_strided_slice %79 {offsets = [2, 0], sizes = [2, 5], strides = [1, 1]} : vector<4x5xf32> to vector<2x5xf32>
    %82 = arith.subf %80, %81 : vector<2x5xf32>
    %83 = vector.extract_strided_slice %79 {offsets = [0, 0], sizes = [2, 5], strides = [1, 1]} : vector<4x5xf32> to vector<2x5xf32>
    %84 = vector.extract_strided_slice %77 {offsets = [2, 0], sizes = [2, 5], strides = [1, 1]} : vector<4x5xf32> to vector<2x5xf32>
    %85 = arith.addf %83, %84 : vector<2x5xf32>
    %86 = tpu.concatenate %82, %85 in 1 : vector<2x5xf32>, vector<2x5xf32> -> vector<2x10xf32>
    %87 = vector.extract_strided_slice %86 {offsets = [0, 0], sizes = [1, 10], strides = [1, 1]} : vector<2x10xf32> to vector<1x10xf32>
    %c0_32 = arith.constant 0 : index
    %c0_33 = arith.constant 0 : index
    %c0_34 = arith.constant 0 : index
    %88 = vector.load %arg5[%c0_32, %c0_33, %c0_34] : memref<2x10x16xf32, #tpu.memory_space<vmem>>, vector<1x10x16xf32>
    %89 = vector.shape_cast %88 : vector<1x10x16xf32> to vector<10x16xf32>
    %cst_35 = arith.constant dense<0.000000e+00> : vector<1x16xf32>
    %90 = tpu.matmul %87, %89, %cst_35 {dimension_numbers = #tpu.dot_dimension_numbers<[1], [0], [0], [1], [0, 0, 1, 1], [], []>} : vector<1x10xf32>, vector<10x16xf32>, vector<1x16xf32> -> vector<1x16xf32>
    %91 = vector.extract_strided_slice %90 {offsets = [0, 0], sizes = [1, 8], strides = [1, 1]} : vector<1x16xf32> to vector<1x8xf32>
    %c0_36 = arith.constant 0 : index
    %c0_37 = arith.constant 0 : index
    %92 = vector.load %arg13[%c0_36, %c0_37] : memref<4x8xf32, #tpu.memory_space<vmem>>, vector<1x8xf32>
    tpu.vector_store %arg13[%c0_36, %c0_37], %91 {strides = array<i32>} : memref<4x8xf32, #tpu.memory_space<vmem>>, vector<1x8xf32>,
    %93 = vector.extract_strided_slice %90 {offsets = [0, 8], sizes = [1, 8], strides = [1, 1]} : vector<1x16xf32> to vector<1x8xf32>
    %c2_38 = arith.constant 2 : index
    %c0_39 = arith.constant 0 : index
    %94 = vector.load %arg13[%c2_38, %c0_39] : memref<4x8xf32, #tpu.memory_space<vmem>>, vector<1x8xf32>
    tpu.vector_store %arg13[%c2_38, %c0_39], %93 {strides = array<i32>} : memref<4x8xf32, #tpu.memory_space<vmem>>, vector<1x8xf32>,
    %95 = vector.extract_strided_slice %86 {offsets = [1, 0], sizes = [1, 10], strides = [1, 1]} : vector<2x10xf32> to vector<1x10xf32>
    %c1_40 = arith.constant 1 : index
    %c0_41 = arith.constant 0 : index
    %c0_42 = arith.constant 0 : index
    %96 = vector.load %arg5[%c1_40, %c0_41, %c0_42] : memref<2x10x16xf32, #tpu.memory_space<vmem>>, vector<1x10x16xf32>
    %97 = vector.shape_cast %96 : vector<1x10x16xf32> to vector<10x16xf32>
    %cst_43 = arith.constant dense<0.000000e+00> : vector<1x16xf32>
    %98 = tpu.matmul %95, %97, %cst_43 {dimension_numbers = #tpu.dot_dimension_numbers<[1], [0], [0], [1], [0, 0, 1, 1], [], []>} : vector<1x10xf32>, vector<10x16xf32>, vector<1x16xf32> -> vector<1x16xf32>
    %99 = vector.extract_strided_slice %98 {offsets = [0, 0], sizes = [1, 8], strides = [1, 1]} : vector<1x16xf32> to vector<1x8xf32>
    %c1_44 = arith.constant 1 : index
    %c0_45 = arith.constant 0 : index
    %100 = vector.load %arg13[%c1_44, %c0_45] : memref<4x8xf32, #tpu.memory_space<vmem>>, vector<1x8xf32>
    tpu.vector_store %arg13[%c1_44, %c0_45], %99 {strides = array<i32>} : memref<4x8xf32, #tpu.memory_space<vmem>>, vector<1x8xf32>,
    %101 = vector.extract_strided_slice %98 {offsets = [0, 8], sizes = [1, 8], strides = [1, 1]} : vector<1x16xf32> to vector<1x8xf32>
    %c3_46 = arith.constant 3 : index
    %c0_47 = arith.constant 0 : index
    %102 = vector.load %arg13[%c3_46, %c0_47] : memref<4x8xf32, #tpu.memory_space<vmem>>, vector<1x8xf32>
    tpu.vector_store %arg13[%c3_46, %c0_47], %101 {strides = array<i32>} : memref<4x8xf32, #tpu.memory_space<vmem>>, vector<1x8xf32>,
    %c0_48 = arith.constant 0 : index
    %c0_49 = arith.constant 0 : index
    %103 = vector.load %arg13[%c0_48, %c0_49] : memref<4x8xf32, #tpu.memory_space<vmem>>, vector<4x8xf32>
    %c0_50 = arith.constant 0 : index
    %c0_51 = arith.constant 0 : index
    %104 = vector.load %arg4[%c0_50, %c0_51] : memref<4x8xf32, #tpu.memory_space<vmem>>, vector<4x8xf32>
    %c1_52 = arith.constant 1 : index
    %c0_53 = arith.constant 0 : index
    %c0_54 = arith.constant 0 : index
    %105 = vector.load %arg0[%c1_52, %c0_53, %c0_54] : memref<3x4x4xf32, #tpu.memory_space<vmem>>, vector<1x4x4xf32>
    %106 = vector.shape_cast %105 : vector<1x4x4xf32> to vector<4x4xf32>
    %cst_55 = arith.constant dense<0.000000e+00> : vector<4x8xf32>
    %107 = tpu.matmul %106, %103, %cst_55 {dimension_numbers = #tpu.dot_dimension_numbers<[1], [0], [0], [1], [0, 0, 1, 1], [], []>} : vector<4x4xf32>, vector<4x8xf32>, vector<4x8xf32> -> vector<4x8xf32>
    %c1_56 = arith.constant 1 : index
    %c0_57 = arith.constant 0 : index
    %c0_58 = arith.constant 0 : index
    %108 = vector.load %arg1[%c1_56, %c0_57, %c0_58] : memref<3x4x4xf32, #tpu.memory_space<vmem>>, vector<1x4x4xf32>
    %109 = vector.shape_cast %108 : vector<1x4x4xf32> to vector<4x4xf32>
    %cst_59 = arith.constant dense<0.000000e+00> : vector<4x8xf32>
    %110 = tpu.matmul %109, %104, %cst_59 {dimension_numbers = #tpu.dot_dimension_numbers<[1], [0], [0], [1], [0, 0, 1, 1], [], []>} : vector<4x4xf32>, vector<4x8xf32>, vector<4x8xf32> -> vector<4x8xf32>
    %111 = vector.extract_strided_slice %110 {offsets = [0, 0], sizes = [1, 8], strides = [1, 1]} : vector<4x8xf32> to vector<1x8xf32>
    %112 = vector.extract_strided_slice %110 {offsets = [2, 0], sizes = [1, 8], strides = [1, 1]} : vector<4x8xf32> to vector<1x8xf32>
    %113 = arith.mulf %111, %111 : vector<1x8xf32>
    %114 = arith.mulf %112, %112 : vector<1x8xf32>
    %115 = arith.subf %113, %114 : vector<1x8xf32>
    %116 = arith.mulf %111, %112 : vector<1x8xf32>
    %117 = arith.mulf %112, %111 : vector<1x8xf32>
    %118 = arith.addf %116, %117 : vector<1x8xf32>
    %119 = arith.mulf %115, %111 : vector<1x8xf32>
    %120 = arith.mulf %118, %112 : vector<1x8xf32>
    %121 = arith.subf %119, %120 : vector<1x8xf32>
    %122 = arith.mulf %115, %112 : vector<1x8xf32>
    %123 = arith.mulf %118, %111 : vector<1x8xf32>
    %124 = arith.addf %122, %123 : vector<1x8xf32>
    %125 = arith.mulf %121, %111 : vector<1x8xf32>
    %126 = arith.mulf %124, %112 : vector<1x8xf32>
    %127 = arith.subf %125, %126 : vector<1x8xf32>
    %128 = arith.mulf %121, %112 : vector<1x8xf32>
    %129 = arith.mulf %124, %111 : vector<1x8xf32>
    %130 = arith.addf %128, %129 : vector<1x8xf32>
    %131 = vector.extract_strided_slice %110 {offsets = [1, 0], sizes = [1, 8], strides = [1, 1]} : vector<4x8xf32> to vector<1x8xf32>
    %132 = vector.extract_strided_slice %110 {offsets = [3, 0], sizes = [1, 8], strides = [1, 1]} : vector<4x8xf32> to vector<1x8xf32>
    %133 = arith.mulf %131, %131 : vector<1x8xf32>
    %134 = arith.mulf %132, %132 : vector<1x8xf32>
    %135 = arith.subf %133, %134 : vector<1x8xf32>
    %136 = arith.mulf %131, %132 : vector<1x8xf32>
    %137 = arith.mulf %132, %131 : vector<1x8xf32>
    %138 = arith.addf %136, %137 : vector<1x8xf32>
    %139 = arith.mulf %135, %131 : vector<1x8xf32>
    %140 = arith.mulf %138, %132 : vector<1x8xf32>
    %141 = arith.subf %139, %140 : vector<1x8xf32>
    %142 = arith.mulf %135, %132 : vector<1x8xf32>
    %143 = arith.mulf %138, %131 : vector<1x8xf32>
    %144 = arith.addf %142, %143 : vector<1x8xf32>
    %145 = arith.mulf %141, %131 : vector<1x8xf32>
    %146 = arith.mulf %144, %132 : vector<1x8xf32>
    %147 = arith.subf %145, %146 : vector<1x8xf32>
    %148 = arith.mulf %141, %132 : vector<1x8xf32>
    %149 = arith.mulf %144, %131 : vector<1x8xf32>
    %150 = arith.addf %148, %149 : vector<1x8xf32>
    %c0_60 = arith.constant 0 : index
    %c0_61 = arith.constant 0 : index
    %151 = vector.load %arg11[%c0_60, %c0_61] : memref<5x8xf32, #tpu.memory_space<vmem>>, vector<1x8xf32>
    tpu.vector_store %arg11[%c0_60, %c0_61], %147 {strides = array<i32>} : memref<5x8xf32, #tpu.memory_space<vmem>>, vector<1x8xf32>,
    %c0_62 = arith.constant 0 : index
    %c0_63 = arith.constant 0 : index
    %152 = vector.load %arg12[%c0_62, %c0_63] : memref<5x8xf32, #tpu.memory_space<vmem>>, vector<1x8xf32>
    tpu.vector_store %arg12[%c0_62, %c0_63], %150 {strides = array<i32>} : memref<5x8xf32, #tpu.memory_space<vmem>>, vector<1x8xf32>,
    %153 = arith.mulf %111, %141 : vector<1x8xf32>
    %154 = arith.mulf %112, %144 : vector<1x8xf32>
    %155 = arith.subf %153, %154 : vector<1x8xf32>
    %156 = arith.mulf %111, %144 : vector<1x8xf32>
    %157 = arith.mulf %112, %141 : vector<1x8xf32>
    %158 = arith.addf %156, %157 : vector<1x8xf32>
    %c1_64 = arith.constant 1 : index
    %c0_65 = arith.constant 0 : index
    %159 = vector.load %arg11[%c1_64, %c0_65] : memref<5x8xf32, #tpu.memory_space<vmem>>, vector<1x8xf32>
    tpu.vector_store %arg11[%c1_64, %c0_65], %155 {strides = array<i32>} : memref<5x8xf32, #tpu.memory_space<vmem>>, vector<1x8xf32>,
    %c1_66 = arith.constant 1 : index
    %c0_67 = arith.constant 0 : index
    %160 = vector.load %arg12[%c1_66, %c0_67] : memref<5x8xf32, #tpu.memory_space<vmem>>, vector<1x8xf32>
    tpu.vector_store %arg12[%c1_66, %c0_67], %158 {strides = array<i32>} : memref<5x8xf32, #tpu.memory_space<vmem>>, vector<1x8xf32>,
    %161 = arith.mulf %115, %135 : vector<1x8xf32>
    %162 = arith.mulf %118, %138 : vector<1x8xf32>
    %163 = arith.subf %161, %162 : vector<1x8xf32>
    %164 = arith.mulf %115, %138 : vector<1x8xf32>
    %165 = arith.mulf %118, %135 : vector<1x8xf32>
    %166 = arith.addf %164, %165 : vector<1x8xf32>
    %c2_68 = arith.constant 2 : index
    %c0_69 = arith.constant 0 : index
    %167 = vector.load %arg11[%c2_68, %c0_69] : memref<5x8xf32, #tpu.memory_space<vmem>>, vector<1x8xf32>
    tpu.vector_store %arg11[%c2_68, %c0_69], %163 {strides = array<i32>} : memref<5x8xf32, #tpu.memory_space<vmem>>, vector<1x8xf32>,
    %c2_70 = arith.constant 2 : index
    %c0_71 = arith.constant 0 : index
    %168 = vector.load %arg12[%c2_70, %c0_71] : memref<5x8xf32, #tpu.memory_space<vmem>>, vector<1x8xf32>
    tpu.vector_store %arg12[%c2_70, %c0_71], %166 {strides = array<i32>} : memref<5x8xf32, #tpu.memory_space<vmem>>, vector<1x8xf32>,
    %169 = arith.mulf %121, %131 : vector<1x8xf32>
    %170 = arith.mulf %124, %132 : vector<1x8xf32>
    %171 = arith.subf %169, %170 : vector<1x8xf32>
    %172 = arith.mulf %121, %132 : vector<1x8xf32>
    %173 = arith.mulf %124, %131 : vector<1x8xf32>
    %174 = arith.addf %172, %173 : vector<1x8xf32>
    %c3_72 = arith.constant 3 : index
    %c0_73 = arith.constant 0 : index
    %175 = vector.load %arg11[%c3_72, %c0_73] : memref<5x8xf32, #tpu.memory_space<vmem>>, vector<1x8xf32>
    tpu.vector_store %arg11[%c3_72, %c0_73], %171 {strides = array<i32>} : memref<5x8xf32, #tpu.memory_space<vmem>>, vector<1x8xf32>,
    %c3_74 = arith.constant 3 : index
    %c0_75 = arith.constant 0 : index
    %176 = vector.load %arg12[%c3_74, %c0_75] : memref<5x8xf32, #tpu.memory_space<vmem>>, vector<1x8xf32>
    tpu.vector_store %arg12[%c3_74, %c0_75], %174 {strides = array<i32>} : memref<5x8xf32, #tpu.memory_space<vmem>>, vector<1x8xf32>,
    %c4_76 = arith.constant 4 : index
    %c0_77 = arith.constant 0 : index
    %177 = vector.load %arg11[%c4_76, %c0_77] : memref<5x8xf32, #tpu.memory_space<vmem>>, vector<1x8xf32>
    tpu.vector_store %arg11[%c4_76, %c0_77], %127 {strides = array<i32>} : memref<5x8xf32, #tpu.memory_space<vmem>>, vector<1x8xf32>,
    %c4_78 = arith.constant 4 : index
    %c0_79 = arith.constant 0 : index
    %178 = vector.load %arg12[%c4_78, %c0_79] : memref<5x8xf32, #tpu.memory_space<vmem>>, vector<1x8xf32>
    tpu.vector_store %arg12[%c4_78, %c0_79], %130 {strides = array<i32>} : memref<5x8xf32, #tpu.memory_space<vmem>>, vector<1x8xf32>,
    %c0_80 = arith.constant 0 : index
    %c0_81 = arith.constant 0 : index
    %179 = vector.load %arg11[%c0_80, %c0_81] : memref<5x8xf32, #tpu.memory_space<vmem>>, vector<5x8xf32>
    %cst_82 = arith.constant dense<0.000000e+00> : vector<4x5xf32>
    %180 = tpu.matmul %107, %179, %cst_82 {dimension_numbers = #tpu.dot_dimension_numbers<[1], [1], [0], [0], [0, 0, 1, 0], [], []>} : vector<4x8xf32>, vector<5x8xf32>, vector<4x5xf32> -> vector<4x5xf32>
    %c0_83 = arith.constant 0 : index
    %c0_84 = arith.constant 0 : index
    %181 = vector.load %arg12[%c0_83, %c0_84] : memref<5x8xf32, #tpu.memory_space<vmem>>, vector<5x8xf32>
    %cst_85 = arith.constant dense<0.000000e+00> : vector<4x5xf32>
    %182 = tpu.matmul %107, %181, %cst_85 {dimension_numbers = #tpu.dot_dimension_numbers<[1], [1], [0], [0], [0, 0, 1, 0], [], []>} : vector<4x8xf32>, vector<5x8xf32>, vector<4x5xf32> -> vector<4x5xf32>
    %183 = vector.extract_strided_slice %180 {offsets = [0, 0], sizes = [2, 5], strides = [1, 1]} : vector<4x5xf32> to vector<2x5xf32>
    %184 = vector.extract_strided_slice %182 {offsets = [2, 0], sizes = [2, 5], strides = [1, 1]} : vector<4x5xf32> to vector<2x5xf32>
    %185 = arith.subf %183, %184 : vector<2x5xf32>
    %186 = vector.extract_strided_slice %182 {offsets = [0, 0], sizes = [2, 5], strides = [1, 1]} : vector<4x5xf32> to vector<2x5xf32>
    %187 = vector.extract_strided_slice %180 {offsets = [2, 0], sizes = [2, 5], strides = [1, 1]} : vector<4x5xf32> to vector<2x5xf32>
    %188 = arith.addf %186, %187 : vector<2x5xf32>
    %189 = tpu.concatenate %185, %188 in 1 : vector<2x5xf32>, vector<2x5xf32> -> vector<2x10xf32>
    %190 = vector.extract_strided_slice %189 {offsets = [0, 0], sizes = [1, 10], strides = [1, 1]} : vector<2x10xf32> to vector<1x10xf32>
    %c0_86 = arith.constant 0 : index
    %c0_87 = arith.constant 0 : index
    %c0_88 = arith.constant 0 : index
    %191 = vector.load %arg5[%c0_86, %c0_87, %c0_88] : memref<2x10x16xf32, #tpu.memory_space<vmem>>, vector<1x10x16xf32>
    %192 = vector.shape_cast %191 : vector<1x10x16xf32> to vector<10x16xf32>
    %cst_89 = arith.constant dense<0.000000e+00> : vector<1x16xf32>
    %193 = tpu.matmul %190, %192, %cst_89 {dimension_numbers = #tpu.dot_dimension_numbers<[1], [0], [0], [1], [0, 0, 1, 1], [], []>} : vector<1x10xf32>, vector<10x16xf32>, vector<1x16xf32> -> vector<1x16xf32>
    %194 = vector.extract_strided_slice %193 {offsets = [0, 0], sizes = [1, 8], strides = [1, 1]} : vector<1x16xf32> to vector<1x8xf32>
    %c0_90 = arith.constant 0 : index
    %c0_91 = arith.constant 0 : index
    %195 = vector.load %arg13[%c0_90, %c0_91] : memref<4x8xf32, #tpu.memory_space<vmem>>, vector<1x8xf32>
    tpu.vector_store %arg13[%c0_90, %c0_91], %194 {strides = array<i32>} : memref<4x8xf32, #tpu.memory_space<vmem>>, vector<1x8xf32>,
    %196 = vector.extract_strided_slice %193 {offsets = [0, 8], sizes = [1, 8], strides = [1, 1]} : vector<1x16xf32> to vector<1x8xf32>
    %c2_92 = arith.constant 2 : index
    %c0_93 = arith.constant 0 : index
    %197 = vector.load %arg13[%c2_92, %c0_93] : memref<4x8xf32, #tpu.memory_space<vmem>>, vector<1x8xf32>
    tpu.vector_store %arg13[%c2_92, %c0_93], %196 {strides = array<i32>} : memref<4x8xf32, #tpu.memory_space<vmem>>, vector<1x8xf32>,
    %198 = vector.extract_strided_slice %189 {offsets = [1, 0], sizes = [1, 10], strides = [1, 1]} : vector<2x10xf32> to vector<1x10xf32>
    %c1_94 = arith.constant 1 : index
    %c0_95 = arith.constant 0 : index
    %c0_96 = arith.constant 0 : index
    %199 = vector.load %arg5[%c1_94, %c0_95, %c0_96] : memref<2x10x16xf32, #tpu.memory_space<vmem>>, vector<1x10x16xf32>
    %200 = vector.shape_cast %199 : vector<1x10x16xf32> to vector<10x16xf32>
    %cst_97 = arith.constant dense<0.000000e+00> : vector<1x16xf32>
    %201 = tpu.matmul %198, %200, %cst_97 {dimension_numbers = #tpu.dot_dimension_numbers<[1], [0], [0], [1], [0, 0, 1, 1], [], []>} : vector<1x10xf32>, vector<10x16xf32>, vector<1x16xf32> -> vector<1x16xf32>
    %202 = vector.extract_strided_slice %201 {offsets = [0, 0], sizes = [1, 8], strides = [1, 1]} : vector<1x16xf32> to vector<1x8xf32>
    %c1_98 = arith.constant 1 : index
    %c0_99 = arith.constant 0 : index
    %203 = vector.load %arg13[%c1_98, %c0_99] : memref<4x8xf32, #tpu.memory_space<vmem>>, vector<1x8xf32>
    tpu.vector_store %arg13[%c1_98, %c0_99], %202 {strides = array<i32>} : memref<4x8xf32, #tpu.memory_space<vmem>>, vector<1x8xf32>,
    %204 = vector.extract_strided_slice %201 {offsets = [0, 8], sizes = [1, 8], strides = [1, 1]} : vector<1x16xf32> to vector<1x8xf32>
    %c3_100 = arith.constant 3 : index
    %c0_101 = arith.constant 0 : index
    %205 = vector.load %arg13[%c3_100, %c0_101] : memref<4x8xf32, #tpu.memory_space<vmem>>, vector<1x8xf32>
    tpu.vector_store %arg13[%c3_100, %c0_101], %204 {strides = array<i32>} : memref<4x8xf32, #tpu.memory_space<vmem>>, vector<1x8xf32>,
    %c0_102 = arith.constant 0 : index
    %c0_103 = arith.constant 0 : index
    %206 = vector.load %arg13[%c0_102, %c0_103] : memref<4x8xf32, #tpu.memory_space<vmem>>, vector<4x8xf32>
    %c0_104 = arith.constant 0 : index
    %c0_105 = arith.constant 0 : index
    %207 = vector.load %arg4[%c0_104, %c0_105] : memref<4x8xf32, #tpu.memory_space<vmem>>, vector<4x8xf32>
    %c2_106 = arith.constant 2 : index
    %c0_107 = arith.constant 0 : index
    %c0_108 = arith.constant 0 : index
    %208 = vector.load %arg0[%c2_106, %c0_107, %c0_108] : memref<3x4x4xf32, #tpu.memory_space<vmem>>, vector<1x4x4xf32>
    %209 = vector.shape_cast %208 : vector<1x4x4xf32> to vector<4x4xf32>
    %cst_109 = arith.constant dense<0.000000e+00> : vector<4x8xf32>
    %210 = tpu.matmul %209, %206, %cst_109 {dimension_numbers = #tpu.dot_dimension_numbers<[1], [0], [0], [1], [0, 0, 1, 1], [], []>} : vector<4x4xf32>, vector<4x8xf32>, vector<4x8xf32> -> vector<4x8xf32>
    %c2_110 = arith.constant 2 : index
    %c0_111 = arith.constant 0 : index
    %c0_112 = arith.constant 0 : index
    %211 = vector.load %arg1[%c2_110, %c0_111, %c0_112] : memref<3x4x4xf32, #tpu.memory_space<vmem>>, vector<1x4x4xf32>
    %212 = vector.shape_cast %211 : vector<1x4x4xf32> to vector<4x4xf32>
    %cst_113 = arith.constant dense<0.000000e+00> : vector<4x8xf32>
    %213 = tpu.matmul %212, %207, %cst_113 {dimension_numbers = #tpu.dot_dimension_numbers<[1], [0], [0], [1], [0, 0, 1, 1], [], []>} : vector<4x4xf32>, vector<4x8xf32>, vector<4x8xf32> -> vector<4x8xf32>
    %214 = vector.extract_strided_slice %213 {offsets = [0, 0], sizes = [1, 8], strides = [1, 1]} : vector<4x8xf32> to vector<1x8xf32>
    %215 = vector.extract_strided_slice %213 {offsets = [2, 0], sizes = [1, 8], strides = [1, 1]} : vector<4x8xf32> to vector<1x8xf32>
    %216 = arith.mulf %214, %214 : vector<1x8xf32>
    %217 = arith.mulf %215, %215 : vector<1x8xf32>
    %218 = arith.subf %216, %217 : vector<1x8xf32>
    %219 = arith.mulf %214, %215 : vector<1x8xf32>
    %220 = arith.mulf %215, %214 : vector<1x8xf32>
    %221 = arith.addf %219, %220 : vector<1x8xf32>
    %222 = arith.mulf %218, %214 : vector<1x8xf32>
    %223 = arith.mulf %221, %215 : vector<1x8xf32>
    %224 = arith.subf %222, %223 : vector<1x8xf32>
    %225 = arith.mulf %218, %215 : vector<1x8xf32>
    %226 = arith.mulf %221, %214 : vector<1x8xf32>
    %227 = arith.addf %225, %226 : vector<1x8xf32>
    %228 = arith.mulf %224, %214 : vector<1x8xf32>
    %229 = arith.mulf %227, %215 : vector<1x8xf32>
    %230 = arith.subf %228, %229 : vector<1x8xf32>
    %231 = arith.mulf %224, %215 : vector<1x8xf32>
    %232 = arith.mulf %227, %214 : vector<1x8xf32>
    %233 = arith.addf %231, %232 : vector<1x8xf32>
    %234 = vector.extract_strided_slice %213 {offsets = [1, 0], sizes = [1, 8], strides = [1, 1]} : vector<4x8xf32> to vector<1x8xf32>
    %235 = vector.extract_strided_slice %213 {offsets = [3, 0], sizes = [1, 8], strides = [1, 1]} : vector<4x8xf32> to vector<1x8xf32>
    %236 = arith.mulf %234, %234 : vector<1x8xf32>
    %237 = arith.mulf %235, %235 : vector<1x8xf32>
    %238 = arith.subf %236, %237 : vector<1x8xf32>
    %239 = arith.mulf %234, %235 : vector<1x8xf32>
    %240 = arith.mulf %235, %234 : vector<1x8xf32>
    %241 = arith.addf %239, %240 : vector<1x8xf32>
    %242 = arith.mulf %238, %234 : vector<1x8xf32>
    %243 = arith.mulf %241, %235 : vector<1x8xf32>
    %244 = arith.subf %242, %243 : vector<1x8xf32>
    %245 = arith.mulf %238, %235 : vector<1x8xf32>
    %246 = arith.mulf %241, %234 : vector<1x8xf32>
    %247 = arith.addf %245, %246 : vector<1x8xf32>
    %248 = arith.mulf %244, %234 : vector<1x8xf32>
    %249 = arith.mulf %247, %235 : vector<1x8xf32>
    %250 = arith.subf %248, %249 : vector<1x8xf32>
    %251 = arith.mulf %244, %235 : vector<1x8xf32>
    %252 = arith.mulf %247, %234 : vector<1x8xf32>
    %253 = arith.addf %251, %252 : vector<1x8xf32>
    %c0_114 = arith.constant 0 : index
    %c0_115 = arith.constant 0 : index
    %254 = vector.load %arg11[%c0_114, %c0_115] : memref<5x8xf32, #tpu.memory_space<vmem>>, vector<1x8xf32>
    tpu.vector_store %arg11[%c0_114, %c0_115], %250 {strides = array<i32>} : memref<5x8xf32, #tpu.memory_space<vmem>>, vector<1x8xf32>,
    %c0_116 = arith.constant 0 : index
    %c0_117 = arith.constant 0 : index
    %255 = vector.load %arg12[%c0_116, %c0_117] : memref<5x8xf32, #tpu.memory_space<vmem>>, vector<1x8xf32>
    tpu.vector_store %arg12[%c0_116, %c0_117], %253 {strides = array<i32>} : memref<5x8xf32, #tpu.memory_space<vmem>>, vector<1x8xf32>,
    %256 = arith.mulf %214, %244 : vector<1x8xf32>
    %257 = arith.mulf %215, %247 : vector<1x8xf32>
    %258 = arith.subf %256, %257 : vector<1x8xf32>
    %259 = arith.mulf %214, %247 : vector<1x8xf32>
    %260 = arith.mulf %215, %244 : vector<1x8xf32>
    %261 = arith.addf %259, %260 : vector<1x8xf32>
    %c1_118 = arith.constant 1 : index
    %c0_119 = arith.constant 0 : index
    %262 = vector.load %arg11[%c1_118, %c0_119] : memref<5x8xf32, #tpu.memory_space<vmem>>, vector<1x8xf32>
    tpu.vector_store %arg11[%c1_118, %c0_119], %258 {strides = array<i32>} : memref<5x8xf32, #tpu.memory_space<vmem>>, vector<1x8xf32>,
    %c1_120 = arith.constant 1 : index
    %c0_121 = arith.constant 0 : index
    %263 = vector.load %arg12[%c1_120, %c0_121] : memref<5x8xf32, #tpu.memory_space<vmem>>, vector<1x8xf32>
    tpu.vector_store %arg12[%c1_120, %c0_121], %261 {strides = array<i32>} : memref<5x8xf32, #tpu.memory_space<vmem>>, vector<1x8xf32>,
    %264 = arith.mulf %218, %238 : vector<1x8xf32>
    %265 = arith.mulf %221, %241 : vector<1x8xf32>
    %266 = arith.subf %264, %265 : vector<1x8xf32>
    %267 = arith.mulf %218, %241 : vector<1x8xf32>
    %268 = arith.mulf %221, %238 : vector<1x8xf32>
    %269 = arith.addf %267, %268 : vector<1x8xf32>
    %c2_122 = arith.constant 2 : index
    %c0_123 = arith.constant 0 : index
    %270 = vector.load %arg11[%c2_122, %c0_123] : memref<5x8xf32, #tpu.memory_space<vmem>>, vector<1x8xf32>
    tpu.vector_store %arg11[%c2_122, %c0_123], %266 {strides = array<i32>} : memref<5x8xf32, #tpu.memory_space<vmem>>, vector<1x8xf32>,
    %c2_124 = arith.constant 2 : index
    %c0_125 = arith.constant 0 : index
    %271 = vector.load %arg12[%c2_124, %c0_125] : memref<5x8xf32, #tpu.memory_space<vmem>>, vector<1x8xf32>
    tpu.vector_store %arg12[%c2_124, %c0_125], %269 {strides = array<i32>} : memref<5x8xf32, #tpu.memory_space<vmem>>, vector<1x8xf32>,
    %272 = arith.mulf %224, %234 : vector<1x8xf32>
    %273 = arith.mulf %227, %235 : vector<1x8xf32>
    %274 = arith.subf %272, %273 : vector<1x8xf32>
    %275 = arith.mulf %224, %235 : vector<1x8xf32>
    %276 = arith.mulf %227, %234 : vector<1x8xf32>
    %277 = arith.addf %275, %276 : vector<1x8xf32>
    %c3_126 = arith.constant 3 : index
    %c0_127 = arith.constant 0 : index
    %278 = vector.load %arg11[%c3_126, %c0_127] : memref<5x8xf32, #tpu.memory_space<vmem>>, vector<1x8xf32>
    tpu.vector_store %arg11[%c3_126, %c0_127], %274 {strides = array<i32>} : memref<5x8xf32, #tpu.memory_space<vmem>>, vector<1x8xf32>,
    %c3_128 = arith.constant 3 : index
    %c0_129 = arith.constant 0 : index
    %279 = vector.load %arg12[%c3_128, %c0_129] : memref<5x8xf32, #tpu.memory_space<vmem>>, vector<1x8xf32>
    tpu.vector_store %arg12[%c3_128, %c0_129], %277 {strides = array<i32>} : memref<5x8xf32, #tpu.memory_space<vmem>>, vector<1x8xf32>,
    %c4_130 = arith.constant 4 : index
    %c0_131 = arith.constant 0 : index
    %280 = vector.load %arg11[%c4_130, %c0_131] : memref<5x8xf32, #tpu.memory_space<vmem>>, vector<1x8xf32>
    tpu.vector_store %arg11[%c4_130, %c0_131], %230 {strides = array<i32>} : memref<5x8xf32, #tpu.memory_space<vmem>>, vector<1x8xf32>,
    %c4_132 = arith.constant 4 : index
    %c0_133 = arith.constant 0 : index
    %281 = vector.load %arg12[%c4_132, %c0_133] : memref<5x8xf32, #tpu.memory_space<vmem>>, vector<1x8xf32>
    tpu.vector_store %arg12[%c4_132, %c0_133], %233 {strides = array<i32>} : memref<5x8xf32, #tpu.memory_space<vmem>>, vector<1x8xf32>,
    %c0_134 = arith.constant 0 : index
    %c0_135 = arith.constant 0 : index
    %282 = vector.load %arg11[%c0_134, %c0_135] : memref<5x8xf32, #tpu.memory_space<vmem>>, vector<5x8xf32>
    %cst_136 = arith.constant dense<0.000000e+00> : vector<4x5xf32>
    %283 = tpu.matmul %210, %282, %cst_136 {dimension_numbers = #tpu.dot_dimension_numbers<[1], [1], [0], [0], [0, 0, 1, 0], [], []>} : vector<4x8xf32>, vector<5x8xf32>, vector<4x5xf32> -> vector<4x5xf32>
    %c0_137 = arith.constant 0 : index
    %c0_138 = arith.constant 0 : index
    %284 = vector.load %arg12[%c0_137, %c0_138] : memref<5x8xf32, #tpu.memory_space<vmem>>, vector<5x8xf32>
    %cst_139 = arith.constant dense<0.000000e+00> : vector<4x5xf32>
    %285 = tpu.matmul %210, %284, %cst_139 {dimension_numbers = #tpu.dot_dimension_numbers<[1], [1], [0], [0], [0, 0, 1, 0], [], []>} : vector<4x8xf32>, vector<5x8xf32>, vector<4x5xf32> -> vector<4x5xf32>
    %286 = vector.extract_strided_slice %283 {offsets = [0, 0], sizes = [2, 5], strides = [1, 1]} : vector<4x5xf32> to vector<2x5xf32>
    %287 = vector.extract_strided_slice %285 {offsets = [2, 0], sizes = [2, 5], strides = [1, 1]} : vector<4x5xf32> to vector<2x5xf32>
    %288 = arith.subf %286, %287 : vector<2x5xf32>
    %289 = vector.extract_strided_slice %285 {offsets = [0, 0], sizes = [2, 5], strides = [1, 1]} : vector<4x5xf32> to vector<2x5xf32>
    %290 = vector.extract_strided_slice %283 {offsets = [2, 0], sizes = [2, 5], strides = [1, 1]} : vector<4x5xf32> to vector<2x5xf32>
    %291 = arith.addf %289, %290 : vector<2x5xf32>
    %292 = tpu.concatenate %288, %291 in 1 : vector<2x5xf32>, vector<2x5xf32> -> vector<2x10xf32>
    %293 = vector.extract_strided_slice %292 {offsets = [0, 0], sizes = [1, 10], strides = [1, 1]} : vector<2x10xf32> to vector<1x10xf32>
    %c0_140 = arith.constant 0 : index
    %c0_141 = arith.constant 0 : index
    %c0_142 = arith.constant 0 : index
    %294 = vector.load %arg6[%c0_140, %c0_141, %c0_142] : memref<2x10x10xf32, #tpu.memory_space<vmem>>, vector<1x10x10xf32>
    %295 = vector.shape_cast %294 : vector<1x10x10xf32> to vector<10x10xf32>
    %cst_143 = arith.constant dense<0.000000e+00> : vector<1x10xf32>
    %296 = tpu.matmul %293, %295, %cst_143 {dimension_numbers = #tpu.dot_dimension_numbers<[1], [0], [0], [1], [0, 0, 1, 1], [], []>} : vector<1x10xf32>, vector<10x10xf32>, vector<1x10xf32> -> vector<1x10xf32>
    %297 = vector.extract_strided_slice %296 {offsets = [0, 0], sizes = [1, 5], strides = [1, 1]} : vector<1x10xf32> to vector<1x5xf32>
    %298 = vector.extract_strided_slice %296 {offsets = [0, 5], sizes = [1, 5], strides = [1, 1]} : vector<1x10xf32> to vector<1x5xf32>
    %c0_144 = arith.constant 0 : index
    %c0_145 = arith.constant 0 : index
    %299 = vector.load %arg14[%c0_144, %c0_145] : memref<4x10xf32, #tpu.memory_space<vmem>>, vector<1x5xf32>
    tpu.vector_store %arg14[%c0_144, %c0_145], %297 {strides = array<i32>} : memref<4x10xf32, #tpu.memory_space<vmem>>, vector<1x5xf32>,
    %c0_146 = arith.constant 0 : index
    %c5 = arith.constant 5 : index
    %300 = vector.load %arg14[%c0_146, %c5] : memref<4x10xf32, #tpu.memory_space<vmem>>, vector<1x5xf32>
    tpu.vector_store %arg14[%c0_146, %c5], %298 {strides = array<i32>} : memref<4x10xf32, #tpu.memory_space<vmem>>, vector<1x5xf32>,
    %cst_147 = arith.constant 0.000000e+00 : f32
    %301 = vector.broadcast %cst_147 : f32 to vector<1x5xf32>
    %302 = arith.subf %301, %298 : vector<1x5xf32>
    %c2_148 = arith.constant 2 : index
    %c0_149 = arith.constant 0 : index
    %303 = vector.load %arg14[%c2_148, %c0_149] : memref<4x10xf32, #tpu.memory_space<vmem>>, vector<1x5xf32>
    tpu.vector_store %arg14[%c2_148, %c0_149], %302 {strides = array<i32>} : memref<4x10xf32, #tpu.memory_space<vmem>>, vector<1x5xf32>,
    %c2_150 = arith.constant 2 : index
    %c5_151 = arith.constant 5 : index
    %304 = vector.load %arg14[%c2_150, %c5_151] : memref<4x10xf32, #tpu.memory_space<vmem>>, vector<1x5xf32>
    tpu.vector_store %arg14[%c2_150, %c5_151], %297 {strides = array<i32>} : memref<4x10xf32, #tpu.memory_space<vmem>>, vector<1x5xf32>,
    %305 = vector.extract_strided_slice %292 {offsets = [1, 0], sizes = [1, 10], strides = [1, 1]} : vector<2x10xf32> to vector<1x10xf32>
    %c1_152 = arith.constant 1 : index
    %c0_153 = arith.constant 0 : index
    %c0_154 = arith.constant 0 : index
    %306 = vector.load %arg6[%c1_152, %c0_153, %c0_154] : memref<2x10x10xf32, #tpu.memory_space<vmem>>, vector<1x10x10xf32>
    %307 = vector.shape_cast %306 : vector<1x10x10xf32> to vector<10x10xf32>
    %cst_155 = arith.constant dense<0.000000e+00> : vector<1x10xf32>
    %308 = tpu.matmul %305, %307, %cst_155 {dimension_numbers = #tpu.dot_dimension_numbers<[1], [0], [0], [1], [0, 0, 1, 1], [], []>} : vector<1x10xf32>, vector<10x10xf32>, vector<1x10xf32> -> vector<1x10xf32>
    %309 = vector.extract_strided_slice %308 {offsets = [0, 0], sizes = [1, 5], strides = [1, 1]} : vector<1x10xf32> to vector<1x5xf32>
    %310 = vector.extract_strided_slice %308 {offsets = [0, 5], sizes = [1, 5], strides = [1, 1]} : vector<1x10xf32> to vector<1x5xf32>
    %c1_156 = arith.constant 1 : index
    %c0_157 = arith.constant 0 : index
    %311 = vector.load %arg14[%c1_156, %c0_157] : memref<4x10xf32, #tpu.memory_space<vmem>>, vector<1x5xf32>
    tpu.vector_store %arg14[%c1_156, %c0_157], %309 {strides = array<i32>} : memref<4x10xf32, #tpu.memory_space<vmem>>, vector<1x5xf32>,
    %c1_158 = arith.constant 1 : index
    %c5_159 = arith.constant 5 : index
    %312 = vector.load %arg14[%c1_158, %c5_159] : memref<4x10xf32, #tpu.memory_space<vmem>>, vector<1x5xf32>
    tpu.vector_store %arg14[%c1_158, %c5_159], %310 {strides = array<i32>} : memref<4x10xf32, #tpu.memory_space<vmem>>, vector<1x5xf32>,
    %cst_160 = arith.constant 0.000000e+00 : f32
    %313 = vector.broadcast %cst_160 : f32 to vector<1x5xf32>
    %314 = arith.subf %313, %310 : vector<1x5xf32>
    %c3_161 = arith.constant 3 : index
    %c0_162 = arith.constant 0 : index
    %315 = vector.load %arg14[%c3_161, %c0_162] : memref<4x10xf32, #tpu.memory_space<vmem>>, vector<1x5xf32>
    tpu.vector_store %arg14[%c3_161, %c0_162], %314 {strides = array<i32>} : memref<4x10xf32, #tpu.memory_space<vmem>>, vector<1x5xf32>,
    %c3_163 = arith.constant 3 : index
    %c5_164 = arith.constant 5 : index
    %316 = vector.load %arg14[%c3_163, %c5_164] : memref<4x10xf32, #tpu.memory_space<vmem>>, vector<1x5xf32>
    tpu.vector_store %arg14[%c3_163, %c5_164], %309 {strides = array<i32>} : memref<4x10xf32, #tpu.memory_space<vmem>>, vector<1x5xf32>,
    %c0_165 = arith.constant 0 : index
    %c0_166 = arith.constant 0 : index
    %317 = vector.load %arg14[%c0_165, %c0_166] : memref<4x10xf32, #tpu.memory_space<vmem>>, vector<4x10xf32>
    %318 = vector.extract_strided_slice %317 {offsets = [0, 0], sizes = [2, 10], strides = [1, 1]} : vector<4x10xf32> to vector<2x10xf32>
    %c0_167 = arith.constant 0 : index
    %c0_168 = arith.constant 0 : index
    %319 = vector.load %arg7[%c0_167, %c0_168] : memref<10x40xf32, #tpu.memory_space<vmem>>, vector<10x40xf32>
    %cst_169 = arith.constant dense<0.000000e+00> : vector<2x40xf32>
    %320 = tpu.matmul %318, %319, %cst_169 {dimension_numbers = #tpu.dot_dimension_numbers<[1], [0], [0], [1], [0, 0, 1, 1], [], []>} : vector<2x10xf32>, vector<10x40xf32>, vector<2x40xf32> -> vector<2x40xf32>
    %321 = vector.extract_strided_slice %320 {offsets = [0, 0], sizes = [2, 10], strides = [1, 1]} : vector<2x40xf32> to vector<2x10xf32>
    %cst_170 = arith.constant dense<0.000000e+00> : vector<2x4xf32>
    %322 = tpu.matmul %321, %317, %cst_170 {dimension_numbers = #tpu.dot_dimension_numbers<[1], [1], [0], [0], [0, 0, 1, 0], [], []>} : vector<2x10xf32>, vector<4x10xf32>, vector<2x4xf32> -> vector<2x4xf32>
    %323 = vector.extract_strided_slice %320 {offsets = [0, 10], sizes = [2, 10], strides = [1, 1]} : vector<2x40xf32> to vector<2x10xf32>
    %cst_171 = arith.constant dense<0.000000e+00> : vector<2x4xf32>
    %324 = tpu.matmul %323, %317, %cst_171 {dimension_numbers = #tpu.dot_dimension_numbers<[1], [1], [0], [0], [0, 0, 1, 0], [], []>} : vector<2x10xf32>, vector<4x10xf32>, vector<2x4xf32> -> vector<2x4xf32>
    %325 = vector.extract_strided_slice %320 {offsets = [0, 20], sizes = [2, 10], strides = [1, 1]} : vector<2x40xf32> to vector<2x10xf32>
    %cst_172 = arith.constant dense<0.000000e+00> : vector<2x4xf32>
    %326 = tpu.matmul %325, %317, %cst_172 {dimension_numbers = #tpu.dot_dimension_numbers<[1], [1], [0], [0], [0, 0, 1, 0], [], []>} : vector<2x10xf32>, vector<4x10xf32>, vector<2x4xf32> -> vector<2x4xf32>
    %327 = vector.extract_strided_slice %320 {offsets = [0, 30], sizes = [2, 10], strides = [1, 1]} : vector<2x40xf32> to vector<2x10xf32>
    %cst_173 = arith.constant dense<0.000000e+00> : vector<2x4xf32>
    %328 = tpu.matmul %327, %317, %cst_173 {dimension_numbers = #tpu.dot_dimension_numbers<[1], [1], [0], [0], [0, 0, 1, 0], [], []>} : vector<2x10xf32>, vector<4x10xf32>, vector<2x4xf32> -> vector<2x4xf32>
    %329 = tpu.concatenate %322, %324, %326, %328 in 1 : vector<2x4xf32>, vector<2x4xf32>, vector<2x4xf32>, vector<2x4xf32> -> vector<2x16xf32>
    %c0_174 = arith.constant 0 : index
    %c0_175 = arith.constant 0 : index
    %330 = vector.load %arg9[%c0_174, %c0_175] : memref<2x16xf32, #tpu.memory_space<vmem>>, vector<2x16xf32>
    tpu.vector_store %arg9[%c0_174, %c0_175], %329 {strides = array<i32>} : memref<2x16xf32, #tpu.memory_space<vmem>>, vector<2x16xf32>,
    %c0_176 = arith.constant 0 : index
    %c0_177 = arith.constant 0 : index
    %331 = vector.load %arg8[%c0_176, %c0_177] : memref<2x16xf32, #tpu.memory_space<vmem>>, vector<2x16xf32>
    %332 = arith.mulf %329, %331 : vector<2x16xf32>
    %333 = vector.shape_cast %332 : vector<2x16xf32> to vector<1x2x16xf32>
    %cst_178 = arith.constant dense<0.000000e+00> : vector<1xf32>
    %334 = vector.multi_reduction <add>, %333, %cst_178 [1, 2] : vector<1x2x16xf32> to vector<1xf32>
    %335 = vector.shape_cast %334 : vector<1xf32> to vector<1x1x1xf32>
    %336 = vector.extract %335[0, 0, 0] : f32 from vector<1x1x1xf32>
    %337 = vector.broadcast %336 : f32 to vector<1x1xf32>
    %c0_179 = arith.constant 0 : index
    %c0_180 = arith.constant 0 : index
    %338 = vector.load %arg10[%c0_179, %c0_180] : memref<1x1xf32, #tpu.memory_space<vmem>>, vector<1x1xf32>
    tpu.vector_store %arg10[%c0_179, %c0_180], %337 {strides = array<i32>} : memref<1x1xf32, #tpu.memory_space<vmem>>, vector<1x1xf32>,
    return
  }
}

</mosaic_0001>

<bundles_post_ra>
// kernel: tpu_custom_call.1
= control target key start
LH: loop header
LB: loop body
LE: loop exit
PB: predicated region body
PF: predicated region fallthrough
CT: control target
= control target key end

     0   :  { %16 = vsyncpa [#allocation7], 0  ;;  %vm43_vm0 = vcmask 1043456   ;;  %vm39_vm1 = vcmask 31744   ;;  %v2490_v1 = vmov 0.0   ;;  %vm2491_vm2 = vmmov 0   ;;  %s2827_s0 = inlined_call_operand.vmem [shape: f32[3,4,4], index: 0, kind: input, shape index: {}]   ;;  %s2828_s1 = inlined_call_operand.vmem [shape: f32[3,4,4], index: 1, kind: input, shape index: {}]   ;;  %s2829_s2 = inlined_call_operand.vmem [shape: f32[4,8], index: 2, kind: input, shape index: {}]   ;;  %s2830_s3 = inlined_call_operand.vmem [shape: f32[4,8], index: 3, kind: input, shape index: {}]   ;;  %s2831_s4 = inlined_call_operand.vmem [shape: f32[4,8], index: 4, kind: input, shape index: {}]   ;;  %s2832_s5 = inlined_call_operand.vmem [shape: f32[2,10,16], index: 5, kind: input, shape index: {}]   ;;  %s2833_s6 = inlined_call_operand.vmem [shape: f32[2,10,10], index: 6, kind: input, shape index: {}]   ;;  %s2834_s7 = inlined_call_operand.vmem [shape: f32[10,40], index: 7, kind: input, shape index: {}]   ;;  %s2835_s8 = inlined_call_operand.vmem [shape: f32[2,16], index: 8, kind: input, shape index: {}]   ;;  %s2836_s9 = inlined_call_operand.hbm [shape: f32[2,16], index: 9, kind: output, shape index: {0}]   ;;  %s2837_s10 = inlined_call_operand.hbm [shape: f32[1,1], index: 10, kind: output, shape index: {1}]  }
   0x1   :  { %v37_v0 = vld [vmem:[%s2830_s3] sm:$0xf]  ;;  %2307 = vmatprep.subr.mxu1 %v2490_v1  ;;  %2309 = vmatprep.mubr.msk.f32.mxu1 %vm2491_vm2, %v2490_v1 }
   0x2   :  { %v117_v2 = vld [vmem:[%s2828_s1] sm:$0xf]  ;;  %2308 = vmatpush3.msk.msra.mxu1 %vm43_vm0, %v37_v0  ;;  %2302 = vmatprep.subr.mxu0 %v2490_v1 }
   0x3   :  { %v36_v3 = vld [vmem:[%s2829_s2] sm:$0xf] }
   0x4   :  { %v38_v4 = vld [vmem:[%s2827_s0] sm:$0xf] }
   0x5   :  { %17 = vsyncpa [#allocation9], 0  ;;  %2310 = vmatmul.mubr.msk.f32.vlgmr.msra.gmra.mxu1 %vm39_vm1, %v117_v2  ;;  %2303 = vmatpush3.msk.msra.mxu0 %vm43_vm0, %v36_v3  ;;  %vm216_vm3 = vcmask 58369   ;;  %vm241_vm4 = vcmask 57344   ;;  %vm273_vm5 = vcmask 64512   ;;  %vm444_vm6 = vcmask 1041408  }
   0x6   :  { %2304 = vmatprep.mubr.msk.f32.mxu0 %vm2491_vm2, %v2490_v1  ;;  %2312 = vmatprep.subr.mxu0 %v2490_v1  ;;  %v439_v57 = vld [vmem:[%s2832_s5 + $0x8] sm:$0x3]  ;;  %v2618_v58 = vld [vmem:[%s2832_s5] sm:$0xff]  ;;  %v2204_v59 = vld [vmem:[%s2832_s5 + $0x18] sm:$0x3]  ;;  %s2492_s27 = smov 5  }
   0x7   :  { %2305 = vmatmul.mubr.msk.f32.vlgmr.msra.gmra.mxu0 %vm39_vm1, %v38_v4  ;;  %2317 = vmatprep.subr.mxu1 %v2490_v1  ;;  %v2626_v60 = vld [vmem:[%s2832_s5 + $0x10] sm:$0xff]  ;;  %vm436_vm7 = vcmask 39936   ;;  %vm440_vm8 = vcmask 80896   ;;  %s2493_s12 = smov 120   ;;  %vm1651_vm9 = vcmask 32768   ;;  %vm1653_vm10 = vcmask 73768  }
   0x8   :  { %2314 = vmatprep.mubr.msk.f32.mxu0 %vm2491_vm2, %v2490_v1  ;;  %2319 = vmatprep.mubr.msk.f32.mxu1 %vm2491_vm2, %v2490_v1  ;;  %s2494_s11 = smov 123   ;;  %s2498_s13 = smov 8   ;;  %vm2146_vm11 = vcmask 97280   ;;  %vm2148_vm12 = vcmask 123904  }
   0x9   :  { %s2499_s14 = smov 4   ;;  %s2500_s15 = smov 12  }
   0xa   :  { %s2501_s18 = smov [#allocation6]  }
  0xc5   :  { %v190_v5 = vpop.f32.mrf.mxu1 }
  0xc6   :  { %v194_v6 = vmul.f32 %v190_v5, %v190_v5  ;;  %v200_v7 = vrot.slane %v190_v5, 2  ;;  %v258_v23 = vrot.slane %v190_v5, 1  ;;  %v261_v24 = vrot.slane %v190_v5, 3 }
  0xc7   :  { %v2311_v8 = vpop.f32.mrf.mxu1  ;;  %v2586_v9 = vpop.f32.mrf.mxu0 }
  0xc8   :  { %v196_v10 = vrot.slane %v194_v6, 2  ;;  %v202_v11 = vmul.f32 %v200_v7, %v190_v5 }
  0xc9   :  { %v2306_v12 = vpop.f32.mrf.mxu0 }
  0xca   :  { %v198_v13 = vsub.f32 %v194_v6, %v196_v10  ;;  %v203_v14 = vadd.f32 %v202_v11, %v202_v11  ;;  %v2210_v10 = vld [vmem:[%s2828_s1 + $0x4] sm:$0xf] }
  0xcc   :  { %v204_v15 = vmul.f32 %v198_v13, %v190_v5  ;;  %v205_v16 = vmul.f32 %v203_v14, %v200_v7  ;;  %v207_v17 = vmul.f32 %v200_v7, %v198_v13  ;;  %v208_v18 = vmul.f32 %v203_v14, %v190_v5 }
  0xcd   :  { %v245_v19 = vrot.slane %v198_v13, 1  ;;  %v249_v20 = vrot.slane %v203_v14, 1 }
  0xce   :  { %v206_v21 = vsub.f32 %v204_v15, %v205_v16  ;;  %v209_v22 = vadd.f32 %v208_v18, %v207_v17 }
  0xcf   :  { %v247_v25 = vmul.f32 %v245_v19, %v198_v13  ;;  %v251_v26 = vmul.f32 %v249_v20, %v203_v14  ;;  %v253_v27 = vmul.f32 %v249_v20, %v198_v13  ;;  %v254_v28 = vmul.f32 %v245_v19, %v203_v14 }
  0xd0   :  { %v210_v29 = vmul.f32 %v206_v21, %v190_v5  ;;  %v211_v30 = vmul.f32 %v209_v22, %v200_v7  ;;  %v213_v31 = vmul.f32 %v206_v21, %v200_v7  ;;  %v214_v32 = vmul.f32 %v209_v22, %v190_v5 }
  0xd1   :  { %v220_v33 = vrot.slane %v206_v21, 1  ;;  %v224_v34 = vrot.slane %v209_v22, 7  ;;  %v231_v35 = vrot.slane %v209_v22, 1  ;;  %v234_v36 = vrot.slane %v206_v21, 7 }
  0xd2   :  { %v212_v37 = vsub.f32 %v210_v29, %v211_v30  ;;  %v215_v38 = vadd.f32 %v214_v32, %v213_v31  ;;  %v252_v39 = vsub.f32 %v247_v25, %v251_v26  ;;  %v255_v40 = vadd.f32 %v254_v28, %v253_v27 }
  0xd3   :  { %v226_v41 = vmul.f32 %v224_v34, %v190_v5  ;;  %v236_v42 = vmul.f32 %v234_v36, %v190_v5  ;;  %v260_v43 = vmul.f32 %v258_v23, %v206_v21  ;;  %v263_v44 = vmul.f32 %v261_v24, %v209_v22 }
  0xd4   :  { %217 = vst.msk [vmem:[#allocation2 - $0x1] sm:$0x2] %vm216_vm3, %v212_v37  ;;  %218 = vst.msk [vmem:[#allocation3 - $0x1] sm:$0x2] %vm216_vm3, %v215_v38  ;;  %v265_v45 = vmul.f32 %v261_v24, %v206_v21  ;;  %v266_v46 = vmul.f32 %v258_v23, %v209_v22  ;;  %v222_v47 = vmul.f32 %v220_v33, %v190_v5 }
  0xd5   :  { %270 = vst.msk [vmem:[#allocation2 + $0x4] sm:$0x1] %vm241_vm4, %v212_v37  ;;  %271 = vst.msk [vmem:[#allocation3 + $0x4] sm:$0x1] %vm241_vm4, %v215_v38  ;;  %v228_v48 = vrot.slane %v226_v41, 2  ;;  %v233_v49 = vmul.f32 %v231_v35, %v190_v5  ;;  %v238_v50 = vrot.slane %v236_v42, 2  ;;  %v264_v51 = vsub.f32 %v260_v43, %v263_v44 }
  0xd6   :  { %256 = vst.msk [vmem:[#allocation2 + $0x2] sm:$0x1] %vm241_vm4, %v252_v39  ;;  %257 = vst.msk [vmem:[#allocation3 + $0x2] sm:$0x1] %vm241_vm4, %v255_v40  ;;  %v267_v52 = vadd.f32 %v266_v46, %v265_v45 }
  0xd7   :  { %v230_v53 = vsub.f32 %v222_v47, %v228_v48  ;;  %v240_v54 = vadd.f32 %v238_v50, %v233_v49  ;;  %268 = vst.msk [vmem:[#allocation2 + $0x3] sm:$0x1] %vm241_vm4, %v264_v51 }
  0xd8   :  { %269 = vst.msk [vmem:[#allocation3 + $0x3] sm:$0x1] %vm241_vm4, %v267_v52 }
  0xd9   :  { %242 = vst.msk [vmem:[#allocation2 + $0x1] sm:$0x1] %vm241_vm4, %v230_v53  ;;  %243 = vst.msk [vmem:[#allocation3 + $0x1] sm:$0x1] %vm241_vm4, %v240_v54 }
  0xe0   :  { %v272_v55 = vld [vmem:[#allocation2] sm:$0x1f]  ;;  %v350_v56 = vld [vmem:[#allocation3] sm:$0x1f] }
  0xe1   :  { %2313 = vmatpush3.xpose.msk.msra.mxu0 %vm273_vm5, %v272_v55  ;;  %2318 = vmatpush3.xpose.msk.msra.mxu1 %vm273_vm5, %v350_v56 }
  0xe2   :  { %2322 = vmatprep.subr.mxu0 %v2490_v1  ;;  %2329 = vmatprep.subr.mxu1 %v2490_v1 }
  0xe4   :  { %2315 = vmatmul.mubr.msk.f32.vlgmr.msra.gmra.mxu0 %vm273_vm5, %v2586_v9  ;;  %2320 = vmatmul.mubr.msk.f32.vlgmr.msra.gmra.mxu1 %vm273_vm5, %v2586_v9  ;;  %v610_v9 = vld [vmem:[%s2831_s4] sm:$0xf] }
  0xe5   :  { %2326 = vmatprep.mubr.msk.f32.mxu0 %vm2491_vm2, %v2490_v1  ;;  %2333 = vmatprep.mubr.msk.f32.mxu1 %vm2491_vm2, %v2490_v1 }
  0xe6   :  { %2323 = vmatpush3.msk.msra.mxu0 %vm444_vm6, %v439_v57  ;;  %2330 = vmatpush3.msk.msra.mxu1 %vm444_vm6, %v2204_v59 }
  0xe7   :  { %2324 = vmatprep.subr.mxu0 %v2490_v1  ;;  %2331 = vmatprep.subr.mxu1 %v2490_v1 }
  0xe8   :  { %2325 = vmatpush3.msra.mxu0 %v2618_v58  ;;  %2332 = vmatpush3.msra.mxu1 %v2626_v60 }
  0xe9   :  { %2336 = vmatprep.subr.mxu0 %v2490_v1  ;;  %2341 = vmatprep.subr.mxu1 %v2490_v1 }
 0x1a4   :  { %v346_v61 = vpop.f32.mrf.mxu0  ;;  %v420_v62 = vpop.f32.mrf.mxu1 }
 0x1a5   :  { %v429_v63 = vrot.slane %v346_v61, 2  ;;  %v425_v0 = vrot.slane %v420_v62, 2 }
 0x1a6   :  { %v2316_v2 = vpop.f32.mrf.mxu0  ;;  %v2321_v3 = vpop.f32.mrf.mxu1 }
 0x1a7   :  { %v427_v4 = vsub.f32 %v346_v61, %v425_v0  ;;  %v431_v5 = vadd.f32 %v429_v63, %v420_v62 }
 0x1a9   :  { %433 = vrot.lane.b32.xlu0 %v431_v5, %s2492_s27  ;;  %v2207_v5 = vld [vmem:[%s2827_s0 + $0x4] sm:$0xf] }
 0x21b   :  { %v434_v6 = vpop.permute.xlu0 %433 }
 0x21c   :  { %v437_v7 = vsel %vm436_vm7, %v427_v4, %v434_v6 }
 0x21d   :  { %v527_v8 = vrot.slane %v437_v7, 1  ;;  %2327 = vmatmul.mubr.msk.f32.vlgmr.msra.gmra.mxu0 %vm440_vm8, %v437_v7 }
 0x21e   :  { %2338 = vmatprep.mubr.msk.f32.mxu0 %vm2491_vm2, %v2490_v1 }
 0x21f   :  { %2334 = vmatmul.mubr.msk.f32.vlgmr.msra.gmra.mxu1 %vm440_vm8, %v527_v8 }
 0x220   :  { %2343 = vmatprep.mubr.msk.f32.mxu1 %vm2491_vm2, %v2490_v1  ;;  %2342 = vmatpush3.msk.msra.mxu1 %vm43_vm0, %v610_v9 }
 0x221   :  { %2351 = vmatprep.subr.mxu1 %v2490_v1 }
 0x223   :  { %2344 = vmatmul.mubr.msk.f32.vlgmr.msra.gmra.mxu1 %vm39_vm1, %v2210_v10  ;;  %v1008_v10 = vld [vmem:[%s2832_s5 + $0x8] sm:$0x3] }
 0x224   :  { %2353 = vmatprep.mubr.msk.f32.mxu1 %vm2491_vm2, %v2490_v1 }
 0x2dd   :  { %v514_v11 = vpop.f32.mrf.mxu0 }
 0x2de   :  { %518 = vst.msk [vmem:[#allocation4] sm:$0x1] %vm241_vm4, %v514_v11  ;;  %520 = vrot.lane.b32.xlu0 %v514_v11, %s2493_s12  ;;  %v2220_v11 = vld [vmem:[%s2832_s5 + $0x18] sm:$0x3]  ;;  %s2171_s5 = sshll.u32 %s2501_s18, 4  ;;  %s2172_s5 = int_to_ptr.vmem [resolvable:$true] %s2171_s5 }
 0x2df   :  { %v2328_v12 = vpop.f32.mrf.mxu0  ;;  %v599_v13 = vpop.f32.mrf.mxu1  ;;  %s2446_s3 = scalar_lea.vmem %s2172_s5, 32  ;;  %p2451_p1 = scmp.lt.s32.totalorder %s2172_s5, %s2172_s5 }
 0x2e0   :  { %603 = vst.msk [vmem:[#allocation4 + $0x1] sm:$0x1] %vm241_vm4, %v599_v13  ;;  %605 = vrot.lane.b32.xlu1 %v599_v13, %s2493_s12  ;;  %p2447_p0 = scmp.ne.s32.totalorder %s2172_s5, %s2446_s3  ;;  %p2452_p2 = scmp.lt.s32.totalorder %s2446_s3, %s2446_s3 }
 0x2e1   :  { %v2335_v14 = vpop.f32.mrf.mxu1 }
 0x2e2   :  { %p2453_p3 = por %p2452_p2, %p2451_p1 }
 0x2e3   :  { %v763_v15 = vpop.f32.mrf.mxu1 }
 0x2e4   :  { %v767_v16 = vmul.f32 %v763_v15, %v763_v15  ;;  %v773_v17 = vrot.slane %v763_v15, 2  ;;  %v829_v31 = vrot.slane %v763_v15, 1  ;;  %v832_v32 = vrot.slane %v763_v15, 3  ;;  %p2454_p4 = pnand %p2453_p3, %p2447_p0 }
 0x2e5   :  { %v2345_v18 = vpop.f32.mrf.mxu1 }
 0x2e6   :  { %v769_v19 = vrot.slane %v767_v16, 2  ;;  %v775_v20 = vmul.f32 %v773_v17, %v763_v15 }
 0x2e8   :  { %v771_v21 = vsub.f32 %v767_v16, %v769_v19  ;;  %v776_v22 = vadd.f32 %v775_v20, %v775_v20 }
 0x2ea   :  { %v777_v23 = vmul.f32 %v771_v21, %v763_v15  ;;  %v778_v24 = vmul.f32 %v776_v22, %v773_v17  ;;  %v780_v25 = vmul.f32 %v773_v17, %v771_v21  ;;  %v781_v26 = vmul.f32 %v776_v22, %v763_v15 }
 0x2eb   :  { %v816_v27 = vrot.slane %v771_v21, 1  ;;  %v820_v28 = vrot.slane %v776_v22, 1 }
 0x2ec   :  { %v779_v29 = vsub.f32 %v777_v23, %v778_v24  ;;  %v782_v30 = vadd.f32 %v781_v26, %v780_v25 }
 0x2ed   :  { %v818_v33 = vmul.f32 %v816_v27, %v771_v21  ;;  %v822_v34 = vmul.f32 %v820_v28, %v776_v22  ;;  %v824_v35 = vmul.f32 %v820_v28, %v771_v21  ;;  %v825_v36 = vmul.f32 %v816_v27, %v776_v22  ;;  %v2226_v22 = vld [vmem:[%s2828_s1 + $0x8] sm:$0xf] }
 0x2ee   :  { %v783_v37 = vmul.f32 %v779_v29, %v763_v15  ;;  %v787_v38 = vmul.f32 %v782_v30, %v763_v15  ;;  %v792_v39 = vrot.slane %v779_v29, 1  ;;  %v796_v40 = vrot.slane %v782_v30, 7 }
 0x2ef   :  { %v803_v41 = vrot.slane %v782_v30, 1  ;;  %v806_v42 = vrot.slane %v779_v29, 7  ;;  %v784_v43 = vmul.f32 %v782_v30, %v773_v17  ;;  %v823_v44 = vsub.f32 %v818_v33, %v822_v34 }
 0x2f0   :  { %v794_v45 = vmul.f32 %v792_v39, %v763_v15  ;;  %v798_v46 = vmul.f32 %v796_v40, %v763_v15  ;;  %v831_v47 = vmul.f32 %v829_v31, %v779_v29  ;;  %v834_v48 = vmul.f32 %v832_v32, %v782_v30 }
 0x2f1   :  { %v805_v49 = vmul.f32 %v803_v41, %v763_v15  ;;  %v808_v50 = vmul.f32 %v806_v42, %v763_v15  ;;  %v785_v51 = vsub.f32 %v783_v37, %v784_v43  ;;  %827 = vst.msk [vmem:[#allocation2 + $0x2] sm:$0x1] %vm241_vm4, %v823_v44  ;;  %v786_v52 = vmul.f32 %v779_v29, %v773_v17 }
 0x2f2   :  { %v800_v53 = vrot.slane %v798_v46, 2  ;;  %v835_v54 = vsub.f32 %v831_v47, %v834_v48  ;;  %v826_v55 = vadd.f32 %v825_v36, %v824_v35  ;;  %v836_v56 = vmul.f32 %v832_v32, %v779_v29 }
 0x2f3   :  { %v810_v57 = vrot.slane %v808_v50, 2  ;;  %789 = vst.msk [vmem:[#allocation2 - $0x1] sm:$0x2] %vm216_vm3, %v785_v51  ;;  %v788_v59 = vadd.f32 %v787_v38, %v786_v52  ;;  %v837_v61 = vmul.f32 %v829_v31, %v782_v30 }
 0x2f4   :  { %841 = vst.msk [vmem:[#allocation2 + $0x4] sm:$0x1] %vm241_vm4, %v785_v51  ;;  %v802_v62 = vsub.f32 %v794_v45, %v800_v53  ;;  %839 = vst.msk [vmem:[#allocation2 + $0x3] sm:$0x1] %vm241_vm4, %v835_v54 }
 0x2f5   :  { %828 = vst.msk [vmem:[#allocation3 + $0x2] sm:$0x1] %vm241_vm4, %v826_v55  ;;  %v812_v63 = vadd.f32 %v810_v57, %v805_v49  ;;  %v838_v0 = vadd.f32 %v837_v61, %v836_v56  ;;  %842 = vst.msk [vmem:[#allocation3 + $0x4] sm:$0x1] %vm241_vm4, %v788_v59 }
 0x2f6   :  { %790 = vst.msk [vmem:[#allocation3 - $0x1] sm:$0x2] %vm216_vm3, %v788_v59 }
 0x2f7   :  { %813 = vst.msk [vmem:[#allocation2 + $0x1] sm:$0x1] %vm241_vm4, %v802_v62  ;;  %814 = vst.msk [vmem:[#allocation3 + $0x1] sm:$0x1] %vm241_vm4, %v812_v63 }
 0x2f8   :  { %840 = vst.msk [vmem:[#allocation3 + $0x3] sm:$0x1] %vm241_vm4, %v838_v0 }
 0x2fe   :  { %v843_v7 = vld [vmem:[#allocation2] sm:$0x1f] }
 0x2ff   :  { %v920_v2 = vld [vmem:[#allocation3] sm:$0x1f] }
 0x300   :  { %2352 = vmatpush3.xpose.msk.msra.mxu1 %vm273_vm5, %v920_v2 }
 0x301   :  { %2363 = vmatprep.subr.mxu1 %v2490_v1 }
 0x350   :  { %v521_v3 = vpop.permute.xlu0 %520 }
 0x351   :  { %523 = vst.msk [vmem:[#allocation4 + $0x2] sm:$0x1] %vm241_vm4, %v521_v3 }
 0x352   :  { %v606_v4 = vpop.permute.xlu1 %605 }
 0x353   :  { %608 = vst.msk [vmem:[#allocation4 + $0x3] sm:$0x1] %vm241_vm4, %v606_v4 }
 0x35a   :  { %v609_v6 = vld [vmem:[#allocation4] sm:$0xf] }
 0x35b   :  { %2337 = vmatpush3.msk.msra.mxu0 %vm43_vm0, %v609_v6 }
 0x35c   :  { %2339 = vmatmul.mubr.msk.f32.vlgmr.msra.gmra.mxu0 %vm39_vm1, %v2207_v5  ;;  %2346 = vmatprep.subr.mxu0 %v2490_v1 }
 0x35d   :  { %2347 = vmatpush3.xpose.msk.msra.mxu0 %vm273_vm5, %v843_v7  ;;  %2348 = vmatprep.mubr.msk.f32.mxu0 %vm2491_vm2, %v2490_v1 }
 0x35e   :  { %2356 = vmatprep.subr.mxu0 %v2490_v1 }
 0x41c   :  { %v685_v8 = vpop.f32.mrf.mxu0 }
 0x41d   :  { %2349 = vmatmul.mubr.msk.f32.vlgmr.msra.gmra.mxu0 %vm273_vm5, %v685_v8  ;;  %2354 = vmatmul.mubr.msk.f32.vlgmr.msra.gmra.mxu1 %vm273_vm5, %v685_v8 }
 0x41e   :  { %v2340_v9 = vpop.f32.mrf.mxu0  ;;  %2360 = vmatprep.mubr.msk.f32.mxu0 %vm2491_vm2, %v2490_v1  ;;  %2367 = vmatprep.mubr.msk.f32.mxu1 %vm2491_vm2, %v2490_v1 }
 0x41f   :  { %2357 = vmatpush3.msk.msra.mxu0 %vm444_vm6, %v1008_v10  ;;  %2364 = vmatpush3.msk.msra.mxu1 %vm444_vm6, %v2220_v11 }
 0x420   :  { %2358 = vmatprep.subr.mxu0 %v2490_v1  ;;  %2365 = vmatprep.subr.mxu1 %v2490_v1 }
 0x421   :  { %2359 = vmatpush3.msra.mxu0 %v2618_v58  ;;  %2366 = vmatpush3.msra.mxu1 %v2626_v60  ;;  %v1176_v60 = vld [vmem:[%s2831_s4] sm:$0xf] }
 0x422   :  { %2370 = vmatprep.subr.mxu0 %v2490_v1  ;;  %2375 = vmatprep.subr.mxu1 %v2490_v1 }
 0x4dd   :  { %v916_v12 = vpop.f32.mrf.mxu0  ;;  %v990_v13 = vpop.f32.mrf.mxu1 }
 0x4de   :  { %v999_v14 = vrot.slane %v916_v12, 2  ;;  %v995_v15 = vrot.slane %v990_v13, 2 }
 0x4df   :  { %v2350_v16 = vpop.f32.mrf.mxu0  ;;  %v2355_v58 = vpop.f32.mrf.mxu1 }
 0x4e0   :  { %v997_v17 = vsub.f32 %v916_v12, %v995_v15  ;;  %v1001_v18 = vadd.f32 %v999_v14, %v990_v13  ;;  %v2223_v58 = vld [vmem:[%s2827_s0 + $0x8] sm:$0xf] }
 0x4e2   :  { %1003 = vrot.lane.b32.xlu1 %v1001_v18, %s2492_s27 }
 0x554   :  { %v1004_v19 = vpop.permute.xlu1 %1003 }
 0x555   :  { %v1006_v20 = vsel %vm436_vm7, %v997_v17, %v1004_v19 }
 0x556   :  { %v1093_v21 = vrot.slane %v1006_v20, 1  ;;  %2361 = vmatmul.mubr.msk.f32.vlgmr.msra.gmra.mxu0 %vm440_vm8, %v1006_v20 }
 0x557   :  { %2372 = vmatprep.mubr.msk.f32.mxu0 %vm2491_vm2, %v2490_v1 }
 0x558   :  { %2368 = vmatmul.mubr.msk.f32.vlgmr.msra.gmra.mxu1 %vm440_vm8, %v1093_v21  ;;  %v1574_v21 = vld [vmem:[%s2833_s6 + $0x8] sm:$0x3] }
 0x559   :  { %2377 = vmatprep.mubr.msk.f32.mxu1 %vm2491_vm2, %v2490_v1  ;;  %2376 = vmatpush3.msk.msra.mxu1 %vm43_vm0, %v1176_v60  ;;  %v1573_v60 = vld [vmem:[%s2833_s6] sm:$0xff] }
 0x55a   :  { %2385 = vmatprep.subr.mxu1 %v2490_v1 }
 0x55c   :  { %2378 = vmatmul.mubr.msk.f32.vlgmr.msra.gmra.mxu1 %vm39_vm1, %v2226_v22  ;;  %v2236_v22 = vld [vmem:[%s2833_s6 + $0x18] sm:$0x3] }
 0x55d   :  { %2387 = vmatprep.mubr.msk.f32.mxu1 %vm2491_vm2, %v2490_v1 }
 0x616   :  { %v1081_v23 = vpop.f32.mrf.mxu0 }
 0x617   :  { %1085 = vst.msk [vmem:[#allocation4] sm:$0x1] %vm241_vm4, %v1081_v23  ;;  %1087 = vrot.lane.b32.xlu0 %v1081_v23, %s2493_s12  ;;  %v2235_v23 = vld [vmem:[%s2833_s6 + $0x10] sm:$0xff] }
 0x618   :  { %v2362_v24 = vpop.f32.mrf.mxu0  ;;  %v1165_v25 = vpop.f32.mrf.mxu1 }
 0x619   :  { %1169 = vst.msk [vmem:[#allocation4 + $0x1] sm:$0x1] %vm241_vm4, %v1165_v25  ;;  %1171 = vrot.lane.b32.xlu1 %v1165_v25, %s2493_s12  ;;  %s2497_s12 = smov 98  }
 0x61a   :  { %v2369_v26 = vpop.f32.mrf.mxu1 }
 0x61c   :  { %v1329_v27 = vpop.f32.mrf.mxu1 }
 0x61d   :  { %v1333_v28 = vmul.f32 %v1329_v27, %v1329_v27  ;;  %v1339_v29 = vrot.slane %v1329_v27, 2  ;;  %v1395_v39 = vrot.slane %v1329_v27, 1  ;;  %v1398_v40 = vrot.slane %v1329_v27, 3 }
 0x61e   :  { %v2379_v30 = vpop.f32.mrf.mxu1 }
 0x61f   :  { %v1335_v31 = vrot.slane %v1333_v28, 2  ;;  %v1341_v32 = vmul.f32 %v1339_v29, %v1329_v27 }
 0x621   :  { %v1337_v33 = vsub.f32 %v1333_v28, %v1335_v31  ;;  %v1342_v34 = vadd.f32 %v1341_v32, %v1341_v32 }
 0x623   :  { %v1343_v35 = vmul.f32 %v1337_v33, %v1329_v27  ;;  %v1344_v36 = vmul.f32 %v1342_v34, %v1339_v29  ;;  %v1346_v37 = vmul.f32 %v1339_v29, %v1337_v33  ;;  %v1347_v38 = vmul.f32 %v1342_v34, %v1329_v27 }
 0x624   :  { %v1382_v41 = vrot.slane %v1337_v33, 1  ;;  %v1386_v42 = vrot.slane %v1342_v34, 1 }
 0x625   :  { %v1345_v43 = vsub.f32 %v1343_v35, %v1344_v36  ;;  %v1348_v44 = vadd.f32 %v1347_v38, %v1346_v37  ;;  %v1760_v35 = vld [vmem:[%s2834_s7 + $0x8] sm:$0x3]  ;;  %v1759_v36 = vld [vmem:[%s2834_s7] sm:$0xff]  ;;  %s2495_s7 = smov 108  }
 0x626   :  { %v1384_v45 = vmul.f32 %v1382_v41, %v1337_v33  ;;  %v1388_v46 = vmul.f32 %v1386_v42, %v1342_v34  ;;  %v1390_v47 = vmul.f32 %v1386_v42, %v1337_v33  ;;  %v1391_v48 = vmul.f32 %v1382_v41, %v1342_v34 }
 0x627   :  { %v1349_v49 = vmul.f32 %v1345_v43, %v1329_v27  ;;  %v1353_v50 = vmul.f32 %v1348_v44, %v1329_v27  ;;  %v1358_v51 = vrot.slane %v1345_v43, 1  ;;  %v1362_v52 = vrot.slane %v1348_v44, 7 }
 0x628   :  { %v1369_v53 = vrot.slane %v1348_v44, 1  ;;  %v1372_v54 = vrot.slane %v1345_v43, 7  ;;  %v1397_v55 = vmul.f32 %v1395_v39, %v1345_v43  ;;  %v1400_v56 = vmul.f32 %v1398_v40, %v1348_v44 }
 0x629   :  { %v1360_v57 = vmul.f32 %v1358_v51, %v1329_v27  ;;  %v1364_v59 = vmul.f32 %v1362_v52, %v1329_v27  ;;  %v1402_v61 = vmul.f32 %v1398_v40, %v1345_v43  ;;  %v1403_v62 = vmul.f32 %v1395_v39, %v1348_v44 }
 0x62a   :  { %v1371_v63 = vmul.f32 %v1369_v53, %v1329_v27  ;;  %v1374_v0 = vmul.f32 %v1372_v54, %v1329_v27  ;;  %v1350_v2 = vmul.f32 %v1348_v44, %v1339_v29  ;;  %v1389_v3 = vsub.f32 %v1384_v45, %v1388_v46 }
 0x62b   :  { %v1366_v4 = vrot.slane %v1364_v59, 2  ;;  %v1401_v5 = vsub.f32 %v1397_v55, %v1400_v56  ;;  %v1352_v6 = vmul.f32 %v1345_v43, %v1339_v29  ;;  %v1392_v7 = vadd.f32 %v1391_v48, %v1390_v47 }
 0x62c   :  { %v1376_v8 = vrot.slane %v1374_v0, 2  ;;  %v1351_v9 = vsub.f32 %v1349_v49, %v1350_v2  ;;  %1393 = vst.msk [vmem:[#allocation2 + $0x2] sm:$0x1] %vm241_vm4, %v1389_v3  ;;  %v1404_v10 = vadd.f32 %v1403_v62, %v1402_v61  ;;  %v2150_v2 = vld [vmem:[%s2835_s8] sm:$0x3] }
 0x62d   :  { %v1368_v11 = vsub.f32 %v1360_v57, %v1366_v4  ;;  %1405 = vst.msk [vmem:[#allocation2 + $0x3] sm:$0x1] %vm241_vm4, %v1401_v5  ;;  %v1354_v12 = vadd.f32 %v1353_v50, %v1352_v6  ;;  %1394 = vst.msk [vmem:[#allocation3 + $0x2] sm:$0x1] %vm241_vm4, %v1392_v7 }
 0x62e   :  { %1355 = vst.msk [vmem:[#allocation2 - $0x1] sm:$0x2] %vm216_vm3, %v1351_v9  ;;  %v1378_v13 = vadd.f32 %v1376_v8, %v1371_v63 }
 0x62f   :  { %1407 = vst.msk [vmem:[#allocation2 + $0x4] sm:$0x1] %vm241_vm4, %v1351_v9  ;;  %1406 = vst.msk [vmem:[#allocation3 + $0x3] sm:$0x1] %vm241_vm4, %v1404_v10 }
 0x630   :  { %1379 = vst.msk [vmem:[#allocation2 + $0x1] sm:$0x1] %vm241_vm4, %v1368_v11  ;;  %1408 = vst.msk [vmem:[#allocation3 + $0x4] sm:$0x1] %vm241_vm4, %v1354_v12 }
 0x631   :  { %1356 = vst.msk [vmem:[#allocation3 - $0x1] sm:$0x2] %vm216_vm3, %v1354_v12 }
 0x632   :  { %1380 = vst.msk [vmem:[#allocation3 + $0x1] sm:$0x1] %vm241_vm4, %v1378_v13 }
 0x637   :  { %v1409_v18 = vld [vmem:[#allocation2] sm:$0x1f] }
 0x639   :  { %v1486_v14 = vld [vmem:[#allocation3] sm:$0x1f] }
 0x63a   :  { %2386 = vmatpush3.xpose.msk.msra.mxu1 %vm273_vm5, %v1486_v14 }
 0x63b   :  { %2397 = vmatprep.subr.mxu1 %v2490_v1 }
 0x689   :  { %v1088_v15 = vpop.permute.xlu0 %1087 }
 0x68a   :  { %1090 = vst.msk [vmem:[#allocation4 + $0x2] sm:$0x1] %vm241_vm4, %v1088_v15 }
 0x68b   :  { %v1172_v16 = vpop.permute.xlu1 %1171 }
 0x68c   :  { %1174 = vst.msk [vmem:[#allocation4 + $0x3] sm:$0x1] %vm241_vm4, %v1172_v16 }
 0x693   :  { %v1175_v17 = vld [vmem:[#allocation4] sm:$0xf] }
 0x694   :  { %2371 = vmatpush3.msk.msra.mxu0 %vm43_vm0, %v1175_v17 }
 0x695   :  { %2373 = vmatmul.mubr.msk.f32.vlgmr.msra.gmra.mxu0 %vm39_vm1, %v2223_v58  ;;  %2380 = vmatprep.subr.mxu0 %v2490_v1 }
 0x696   :  { %2381 = vmatpush3.xpose.msk.msra.mxu0 %vm273_vm5, %v1409_v18  ;;  %2382 = vmatprep.mubr.msk.f32.mxu0 %vm2491_vm2, %v2490_v1 }
 0x697   :  { %2390 = vmatprep.subr.mxu0 %v2490_v1 }
 0x755   :  { %v1251_v19 = vpop.f32.mrf.mxu0 }
 0x756   :  { %2383 = vmatmul.mubr.msk.f32.vlgmr.msra.gmra.mxu0 %vm273_vm5, %v1251_v19  ;;  %2388 = vmatmul.mubr.msk.f32.vlgmr.msra.gmra.mxu1 %vm273_vm5, %v1251_v19 }
 0x757   :  { %v2374_v20 = vpop.f32.mrf.mxu0  ;;  %2394 = vmatprep.mubr.msk.f32.mxu0 %vm2491_vm2, %v2490_v1  ;;  %2401 = vmatprep.mubr.msk.f32.mxu1 %vm2491_vm2, %v2490_v1 }
 0x758   :  { %2391 = vmatpush3.msk.msra.mxu0 %vm444_vm6, %v1574_v21  ;;  %2398 = vmatpush3.msk.msra.mxu1 %vm444_vm6, %v2236_v22 }
 0x759   :  { %2392 = vmatprep.subr.mxu0 %v2490_v1  ;;  %2399 = vmatprep.subr.mxu1 %v2490_v1 }
 0x75a   :  { %2393 = vmatpush3.msra.mxu0 %v1573_v60  ;;  %2400 = vmatpush3.msra.mxu1 %v2235_v23 }
 0x75b   :  { %2404 = vmatprep.subr.mxu0 %v2490_v1  ;;  %2411 = vmatprep.subr.mxu1 %v2490_v1 }
 0x816   :  { %v1482_v24 = vpop.f32.mrf.mxu0  ;;  %v1556_v25 = vpop.f32.mrf.mxu1 }
 0x817   :  { %v1565_v26 = vrot.slane %v1482_v24, 2  ;;  %v1561_v27 = vrot.slane %v1556_v25, 2 }
 0x818   :  { %v2384_v28 = vpop.f32.mrf.mxu0  ;;  %v2389_v29 = vpop.f32.mrf.mxu1 }
 0x819   :  { %v1563_v30 = vsub.f32 %v1482_v24, %v1561_v27  ;;  %v1567_v31 = vadd.f32 %v1565_v26, %v1556_v25 }
 0x81b   :  { %1569 = vrot.lane.b32.xlu0 %v1567_v31, %s2492_s27 }
 0x88d   :  { %v1570_v32 = vpop.permute.xlu0 %1569 }
 0x88e   :  { %v1572_v33 = vsel %vm436_vm7, %v1563_v30, %v1570_v32 }
 0x88f   :  { %v1669_v34 = vrot.slane %v1572_v33, 1  ;;  %2395 = vmatmul.mubr.msk.f32.vlgmr.msra.gmra.mxu0 %vm440_vm8, %v1572_v33 }
 0x890   :  { %2408 = vmatprep.mubr.msk.f32.mxu0 %vm2491_vm2, %v2490_v1  ;;  %2405 = vmatpush3.msk.msra.mxu0 %vm444_vm6, %v1760_v35 }
 0x891   :  { %2402 = vmatmul.mubr.msk.f32.vlgmr.msra.gmra.mxu1 %vm440_vm8, %v1669_v34  ;;  %2406 = vmatprep.subr.mxu0 %v2490_v1 }
 0x892   :  { %2413 = vmatprep.mubr.msk.f32.mxu1 %vm2491_vm2, %v2490_v1  ;;  %2407 = vmatpush3.msra.mxu0 %v1759_v36 }
 0x893   :  { %2416 = vmatprep.subr.mxu0 %v2490_v1 }
 0x94f   :  { %v1647_v37 = vpop.f32.mrf.mxu0 }
 0x950   :  { %v1655_v38 = vsub.f32 0.0, %v1647_v37  ;;  %1652 = vst.msk [vmem:[#allocation5] sm:$0x1] %vm1651_vm9, %v1647_v37 }
 0x951   :  { %v2396_v39 = vpop.f32.mrf.mxu0  ;;  %v1741_v40 = vpop.f32.mrf.mxu1  ;;  %1654 = vst.msk [vmem:[#allocation5] sm:$0x1] %vm1653_vm10, %v1647_v37 }
 0x952   :  { %1657 = vrot.lane.b32.xlu1 %v1655_v38, %s2494_s11  ;;  %v1747_v41 = vsub.f32 0.0, %v1741_v40  ;;  %1745 = vst.msk [vmem:[#allocation5 + $0x1] sm:$0x1] %vm1651_vm9, %v1741_v40 }
 0x953   :  { %v2403_v42 = vpop.f32.mrf.mxu1  ;;  %1746 = vst.msk [vmem:[#allocation5 + $0x1] sm:$0x1] %vm1653_vm10, %v1741_v40 }
 0x954   :  { %1749 = vrot.lane.b32.xlu0 %v1747_v41, %s2494_s11 }
 0x956   :  { %1662 = vrot.lane.b32.xlu1 %v1647_v37, %s2492_s27 }
 0x958   :  { %1754 = vrot.lane.b32.xlu0 %v1741_v40, %s2492_s27  ;;  %s2496_s27 = smov 118  }
 0x9c4   :  { %v1658_v43 = vpop.permute.xlu1 %1657 }
 0x9c5   :  { %1660 = vst.msk [vmem:[#allocation5 + $0x2] sm:$0x1] %vm1651_vm9, %v1658_v43 }
 0x9c6   :  { %v1750_v44 = vpop.permute.xlu0 %1749 }
 0x9c7   :  { %1752 = vst.msk [vmem:[#allocation5 + $0x3] sm:$0x1] %vm1651_vm9, %v1750_v44 }
 0x9c8   :  { %v1663_v45 = vpop.permute.xlu1 %1662 }
 0x9c9   :  { %1665 = vst.msk [vmem:[#allocation5 + $0x2] sm:$0x1] %vm1653_vm10, %v1663_v45 }
 0x9ca   :  { %v1755_v46 = vpop.permute.xlu0 %1754 }
 0x9cb   :  { %1757 = vst.msk [vmem:[#allocation5 + $0x3] sm:$0x1] %vm1653_vm10, %v1755_v46 }
 0x9d2   :  { %v1758_v47 = vld [vmem:[#allocation5] sm:$0xf] }
 0x9d3   :  { %2409 = vmatmul.mubr.msk.f32.vlgmr.msra.gmra.mxu0 %vm440_vm8, %v1758_v47  ;;  %2412 = vmatpush3.xpose.msk.msra.mxu1 %vm440_vm8, %v1758_v47 }
 0x9d4   :  { %2417 = vmatpush3.xpose.msk.msra.mxu0 %vm440_vm8, %v1758_v47  ;;  %2421 = vmatprep.subr.mxu1 %v2490_v1 }
 0x9d5   :  { %2418 = vmatprep.mubr.msk.f32.mxu0 %vm2491_vm2, %v2490_v1  ;;  %2426 = vmatprep.subr.mxu0 %v2490_v1 }
 0xa93   :  { %v1833_v48 = vpop.f32.mrf.mxu0 }
 0xa94   :  { %1984 = vrot.lane.b32.xlu0 %v1833_v48, %s2495_s7  ;;  %1910 = vrot.lane.b32.xlu1 %v1833_v48, %s2496_s27 }
 0xa95   :  { %2414 = vmatmul.mubr.msk.f32.vlgmr.msra.gmra.mxu1 %vm440_vm8, %v1833_v48  ;;  %v2410_v49 = vpop.f32.mrf.mxu0 }
 0xa96   :  { %2422 = vmatpush3.xpose.msk.msra.mxu1 %vm440_vm8, %v1758_v47  ;;  %2423 = vmatprep.mubr.msk.f32.mxu1 %vm2491_vm2, %v2490_v1 }
 0xa98   :  { %2058 = vrot.lane.b32.xlu1 %v1833_v48, %s2497_s12 }
 0xb06   :  { %v1985_v50 = vpop.permute.xlu0 %1984  ;;  %v1911_v51 = vpop.permute.xlu1 %1910 }
 0xb07   :  { %2419 = vmatmul.mubr.msk.f32.vlgmr.msra.gmra.mxu0 %vm440_vm8, %v1911_v51  ;;  %2424 = vmatmul.mubr.msk.f32.vlgmr.msra.gmra.mxu1 %vm440_vm8, %v1985_v50 }
 0xb08   :  { %2427 = vmatpush3.xpose.msk.msra.mxu0 %vm440_vm8, %v1758_v47  ;;  %2428 = vmatprep.mubr.msk.f32.mxu0 %vm2491_vm2, %v2490_v1 }
 0xb0a   :  { %v2059_v52 = vpop.permute.xlu1 %2058 }
 0xb0b   :  { %2429 = vmatmul.mubr.msk.f32.vlgmr.msra.gmra.mxu0 %vm440_vm8, %v2059_v52 }
 0xb55   :  { %v1906_v53 = vpop.f32.mrf.mxu1 }
 0xb57   :  { %v2415_v54 = vpop.f32.mrf.mxu1 }
 0xbc7   :  { %v1980_v55 = vpop.f32.mrf.mxu0  ;;  %v2054_v56 = vpop.f32.mrf.mxu1 }
 0xbc8   :  { %2137 = vrot.lane.b32.xlu1 %v2054_v56, %s2498_s13  ;;  %2133 = vrot.lane.b32.xlu0 %v1980_v55, %s2499_s14 }
 0xbc9   :  { %v2420_v57 = vpop.f32.mrf.mxu0  ;;  %v2425_v59 = vpop.f32.mrf.mxu1 }
 0xbcb   :  { %v2128_v61 = vpop.f32.mrf.mxu0 }
 0xbcc   :  { %2141 = vrot.lane.b32.xlu0 %v2128_v61, %s2500_s15 }
 0xbcd   :  { %v2430_v62 = vpop.f32.mrf.mxu0 }
 0xc3a   :  { %v2134_v63 = vpop.permute.xlu0 %2133  ;;  %v2138_v0 = vpop.permute.xlu1 %2137 }
 0xc3b   :  { %v2144_v1 = vsel %vm39_vm1, %v1906_v53, %v2134_v63 }
 0xc3c   :  { %v2145_v3 = vsel %vm273_vm5, %v2144_v1, %v2138_v0 }
 0xc3e   :  { %v2142_v4 = vpop.permute.xlu0 %2141 }
 0xc3f   :  { %v2147_v5 = vsel %vm2146_vm11, %v2145_v3, %v2142_v4 }
 0xc40   :  { %v2151_v6 = vmul.f32 %v2150_v2, %v2147_v5  ;;  %2149 = vst.msk [vmem:[#allocation6] sm:$0x3] %vm2148_vm12, %v2147_v5 }
 0xc42   :  { %v2152_v7 = vsel %vm2148_vm12, %v2151_v6, 0.0 }
 0xc43   :  { %2153 = vadd.xlane.f32.xlu1 %v2152_v7 }
 0xc44   :  { %2457 = shalt.err (!%p2454_p4)
}
 0xc45   :  { %2174 = dma.vmem_to_hbm [thread:$0]  %s2172_s5, 32, %s2836_s9, [#allocation7]   ;;  %vm2163_vm13 = vcmask 0  }
 0xc46   :  { %s2502_s2 = smov [#allocation8]  }
 0xc47   :  { %s2181_s1 = sshll.u32 %s2502_s2, 4  ;;  %s2182_s1 = int_to_ptr.vmem [resolvable:$true] %s2181_s1 }
 0xc48   :  { %s2466_s0 = scalar_lea.vmem %s2182_s1, 16  ;;  %s2470_s20 = scalar_lea.vmem %s2182_s1, 32 }
 0xc49   :  { %p2467_p5 = scmp.ne.s32.totalorder %s2182_s1, %s2466_s0  ;;  %p2471_p6 = scmp.lt.s32.totalorder %s2182_s1, %s2182_s1 }
 0xc4a   :  { %p2472_p7 = scmp.lt.s32.totalorder %s2470_s20, %s2466_s0 }
 0xc4c   :  { %p2473_p8 = por %p2472_p7, %p2471_p6 }
 0xc4e   :  { %p2474_p9 = pnand %p2473_p8, %p2467_p5 }
 0xccc   :  { %v2154_v8 = vpop.xlane.xlu1 %2153 }
 0xccd   :  { %v2155_v9 = vrot.slane %v2154_v8, 4 }
 0xccf   :  { %v2156_v10 = vadd.f32 %v2155_v9, %v2154_v8 }
 0xcd1   :  { %v2157_v11 = vrot.slane %v2156_v10, 2 }
 0xcd3   :  { %v2158_v12 = vadd.f32 %v2157_v11, %v2156_v10 }
 0xcd5   :  { %v2159_v13 = vrot.slane %v2158_v12, 1 }
 0xcd7   :  { %v2160_v14 = vadd.f32 %v2159_v13, %v2158_v12 }
 0xcd9   :  { %2431 = vpush %v2160_v14 }
 0xd0a   :  { %s2432_s4 = spop %2431 }
 0xd0b   :  { %v2162_v15 = vstv %s2432_s4 }
 0xd0c   :  { %2164 = vst.msk [vmem:[#allocation8] sm:$0x1] %vm2163_vm13, %v2162_v15 }
 0xd0d   :  { %2477 = shalt.err (!%p2474_p9)
}
 0xd0e   :  { %2184 = dma.vmem_to_hbm [thread:$0]  %s2182_s1, 16, %s2837_s10, [#allocation9]  }
 0xd0f   :  { %2486 = dma.done.wait [#allocation7], 32  }
 0xd10   :  { %2487 = vsyncadd [#allocation7], 4294967264 }
 0xd11   :  { %2488 = dma.done.wait [#allocation9], 16  }
 0xd12   :  { %2489 = vsyncadd [#allocation9], 4294967280 }
 0xd13   :  { %2191 = vsyncpa [#allocation7], 1 }
 0xd14   :  { %2192 = vsyncpa [#allocation9], 1 }

</bundles_post_ra>
